<compile_context>
chip_gen: v7x
topology: tpu7x:2x2x1
jax: 0.10.0
libtpu: 0.0.40
codegen_flags: <defaults>
</compile_context>

<pallas_src>
import functools
import numpy as np
import jax
import jax.numpy as jnp
from jax.experimental import pallas as pl
from jax.experimental.pallas import tpu as pltpu

PAD_token = 1


# ----------------------------------------------------------------------------
# Pallas kernel
# ----------------------------------------------------------------------------
def encoder_memnn_kernel(story_ref, wfold_ref, bi_ref, whhbd_ref, bh_ref, out_ref,
                         *, B, L, M, V, E, H, hops):
    # PyTorch GRU (batch_first=False) sees m_A as (seq=B, batch=L, feat=E):
    T, N = B, L
    nch = 2 * (hops + 1)          # forward + backward chain per hop
    C = nch * H                   # stacked hidden width (128 for the test config)
    half = C // 2
    BL = B * L

    # --- bag-of-words counts: one broadcast compare + sublane reduce ---------
    story = story_ref[...]                                                # (BL, M) int32
    v_iota = jax.lax.broadcasted_iota(jnp.int32, (BL, M, V), 2)
    bag = jnp.sum((story[:, :, None] == v_iota).astype(jnp.float32), axis=1)   # (BL, V)

    # --- ONE matmul: embedding-sum + GRU input projection, all hops/dirs -----
    # bias b_ih added once for all timesteps (hoisted out of the recurrence).
    gi_all = jnp.dot(bag, wfold_ref[...],
                     preferred_element_type=jnp.float32) + bi_ref[...]         # (BL, 3C)

    # --- stacked bidirectional GRU recurrence (block-diagonal W_hh) ----------
    whh_bd = whhbd_ref[...]                                               # (C, 3C)
    bh_all = jnp.broadcast_to(bh_ref[...], (N, 3 * C))                    # hoisted broadcast
    lane = jax.lax.broadcasted_iota(jnp.int32, (N, 3 * C), 1)
    is_fwd_lane = (lane % C) < half   # per gate block: [0,half)=fwd chains, [half,C)=bwd

    h_all = jnp.zeros((N, C), jnp.float32)
    outs_f = [None] * T
    outs_b = [None] * T
    for s in range(T):                                                    # T is tiny & static
        tb = T - 1 - s
        gi = jnp.where(is_fwd_lane,
                       gi_all[s * N:(s + 1) * N, :],
                       gi_all[tb * N:(tb + 1) * N, :])                    # (N, 3C)
        gh = jnp.dot(h_all, whh_bd, preferred_element_type=jnp.float32) + bh_all
        r = jax.nn.sigmoid(gi[:, 0:C] + gh[:, 0:C])                       # 128-aligned slices
        z = jax.nn.sigmoid(gi[:, C:2 * C] + gh[:, C:2 * C])
        g = jnp.tanh(gi[:, 2 * C:3 * C] + r * gh[:, 2 * C:3 * C])         # PyTorch: r*(Whn h+bhn)
        h_all = (1.0 - z) * g + z * h_all
        outs_f[s] = h_all[:, 0:half]
        outs_b[tb] = h_all[:, half:C]

    out_f = jnp.concatenate(outs_f, axis=0).reshape(B, L, half)           # fwd outs, hop-major
    out_b = jnp.concatenate(outs_b, axis=0).reshape(B, L, half)           # bwd outs, hop-major

    # --- memory-hop attention, vectorized over batch --------------------------
    u_f = jnp.zeros((B, H), jnp.float32)
    u_b = jnp.zeros((B, H), jnp.float32)
    for hop in range(hops):
        mAf = out_f[:, :, hop * H:(hop + 1) * H]
        mAb = out_b[:, :, hop * H:(hop + 1) * H]
        mCf = out_f[:, :, (hop + 1) * H:(hop + 2) * H]
        mCb = out_b[:, :, (hop + 1) * H:(hop + 2) * H]
        s_att = (jnp.sum(mAf * u_f[:, None, :], axis=2)
                 + jnp.sum(mAb * u_b[:, None, :], axis=2))                # (B, L)
        s_att = s_att - jnp.max(s_att, axis=1, keepdims=True)
        e_att = jnp.exp(s_att)
        p = e_att / jnp.sum(e_att, axis=1, keepdims=True)                 # softmax over L
        u_f = u_f + jnp.sum(p[:, :, None] * mCf, axis=1)
        u_b = u_b + jnp.sum(p[:, :, None] * mCb, axis=1)

    out_ref[...] = jnp.concatenate([u_f, u_b], axis=1)                    # (B, E)


# ----------------------------------------------------------------------------
# Wrapper-side weight preparation (folding / stacking)
# ----------------------------------------------------------------------------
def fold_params(params, hops):
    """Build the folded/stacked weights consumed by the kernel.

    Gate layout (lanes of width 3C): [0,C)=r, [C,2C)=z, [2C,3C)=n.
    Within each gate block: lanes [0,C/2) are forward chains (hop-major, H each),
    lanes [C/2,C) are backward chains.  W_fold[v] = (C_emb[h] @ W_ih[h,d]^T)[v]
    placed at the chain's columns; W_hh is block-diagonal over chains.
    """
    c = params['c']
    n = hops + 1
    V, E = c.shape[1], c.shape[2]
    H = E // 2
    C = 2 * n * H
    half = C // 2

    w_fold = jnp.zeros((V, 3 * C), jnp.float32)
    b_i = jnp.zeros((1, 3 * C), jnp.float32)
    whh_bd = jnp.zeros((C, 3 * C), jnp.float32)
    b_h = jnp.zeros((1, 3 * C), jnp.float32)

    per_dir = (
        (params['wih_f'], params['whh_f'], params['bih_f'], params['bhh_f']),
        (params['wih_b'], params['whh_b'], params['bih_b'], params['bhh_b']),
    )
    for h in range(n):
        for d, (wih_t, whh_t, bih, bhh) in enumerate(per_dir):
            col0 = d * half + h * H            # chain's lane offset inside each gate block
            emb_w = jnp.dot(c[h], wih_t[h])    # (V, 3H): embedding folded into input proj
            for g in range(3):
                dst = g * C + col0
                w_fold = w_fold.at[:, dst:dst + H].set(emb_w[:, g * H:(g + 1) * H])
                b_i = b_i.at[:, dst:dst + H].set(bih[h][:, g * H:(g + 1) * H])
                whh_bd = whh_bd.at[col0:col0 + H, dst:dst + H].set(
                    whh_t[h][:, g * H:(g + 1) * H])
                b_h = b_h.at[:, dst:dst + H].set(bhh[h][:, g * H:(g + 1) * H])
    return w_fold, b_i, whh_bd, b_h


def encoder_memnn_forward(story, params, *, hops):
    # story: (max_len L, batch B, mem_token M) int32 — same layout the PyTorch
    # forward receives (it then does story.transpose(0,1)).
    L, B, M = story.shape
    _, V, E = params['c'].shape
    H = E // 2
    story_bl = jnp.transpose(story, (1, 0, 2)).reshape(B * L, M).astype(jnp.int32)
    w_fold, b_i, whh_bd, b_h = fold_params(params, hops)
    # TODO(synk): unk_mask random binomial token dropout is training-only; eval path implemented.
    # TODO(synk): for realistic vocab sizes keep the embedding/W_fold in HBM (pl.ANY) and
    # DMA-gather rows instead of the (BL,V) one-hot matmul; V=32 here fits VMEM trivially.
    kernel = functools.partial(encoder_memnn_kernel,
                               B=B, L=L, M=M, V=V, E=E, H=H, hops=hops)
    args = (story_bl, w_fold, b_i, whh_bd, b_h)
    return pl.pallas_call(
        kernel,
        out_shape=jax.ShapeDtypeStruct((B, E), jnp.float32),
        in_specs=[pl.BlockSpec(memory_space=pltpu.MemorySpace.VMEM)] * len(args),
        out_specs=pl.BlockSpec(memory_space=pltpu.MemorySpace.VMEM),
    )(*args)


# ----------------------------------------------------------------------------
# Pure-JAX reference (faithful, unfolded PyTorch semantics)
# ----------------------------------------------------------------------------
def _gru_direction(x_flat, T, N, w_ih_t, w_hh_t, b_ih, b_hh, H, reverse):
    h = jnp.zeros((N, H), jnp.float32)
    outs = [None] * T
    order = range(T - 1, -1, -1) if reverse else range(T)
    for t in order:
        x = x_flat[t * N:(t + 1) * N, :]
        gi = jnp.dot(x, w_ih_t, preferred_element_type=jnp.float32) + b_ih
        gh = jnp.dot(h, w_hh_t, preferred_element_type=jnp.float32) + b_hh
        r = jax.nn.sigmoid(gi[:, 0:H] + gh[:, 0:H])
        z = jax.nn.sigmoid(gi[:, H:2 * H] + gh[:, H:2 * H])
        n = jnp.tanh(gi[:, 2 * H:3 * H] + r * gh[:, 2 * H:3 * H])
        h = (1.0 - z) * n + z * h
        outs[t] = h
    return jnp.concatenate(outs, axis=0)


def _memnn_math(story_bl, c, wih_f, whh_f, bih_f, bhh_f,
                wih_b, whh_b, bih_b, bhh_b, *, B, L, M, V, E, H, hops):
    BL = B * L
    v_iota = jax.lax.broadcasted_iota(jnp.int32, (BL, V), 1)
    bag = jnp.zeros((BL, V), jnp.float32)
    for m in range(M):
        bag = bag + (story_bl[:, m:m + 1] == v_iota).astype(jnp.float32)

    mem = []
    for h in range(hops + 1):
        emb = jnp.dot(bag, c[h], preferred_element_type=jnp.float32)
        out_f = _gru_direction(emb, B, L, wih_f[h], whh_f[h], bih_f[h], bhh_f[h], H, False)
        out_b = _gru_direction(emb, B, L, wih_b[h], whh_b[h], bih_b[h], bhh_b[h], H, True)
        mem.append(jnp.concatenate([out_f, out_b], axis=1))

    u = jnp.zeros((B, E), jnp.float32)
    for hop in range(hops):
        m_A, m_C = mem[hop], mem[hop + 1]
        o_rows = []
        for b in range(B):
            mA_b = m_A[b * L:(b + 1) * L, :]
            mC_b = m_C[b * L:(b + 1) * L, :]
            s = jnp.sum(mA_b * u[b:b + 1, :], axis=1, keepdims=True)
            s = s - jnp.max(s, axis=0, keepdims=True)
            e = jnp.exp(s)
            p = e / jnp.sum(e, axis=0, keepdims=True)
            o_rows.append(jnp.sum(mC_b * p, axis=0, keepdims=True))
        u = u + jnp.concatenate(o_rows, axis=0)
    return u


def encoder_memnn_reference(story, params, *, hops):
    L, B, M = story.shape
    _, V, E = params['c'].shape
    H = E // 2
    story_bl = jnp.transpose(story, (1, 0, 2)).reshape(B * L, M).astype(jnp.int32)
    return _memnn_math(story_bl, params['c'],
                       params['wih_f'], params['whh_f'], params['bih_f'], params['bhh_f'],
                       params['wih_b'], params['whh_b'], params['bih_b'], params['bhh_b'],
                       B=B, L=L, M=M, V=V, E=E, H=H, hops=hops)


# ----------------------------------------------------------------------------
# Parameter init (PyTorch-equivalent)
# ----------------------------------------------------------------------------
def init_params(key, vocab, embedding_dim, hops):
    E, V, H = embedding_dim, vocab, embedding_dim // 2
    n = hops + 1
    ks = jax.random.split(key, 10)
    c = 0.1 * jax.random.normal(ks[0], (n, V, E), jnp.float32)       # C.weight.normal_(0, 0.1)
    c = c.at[:, PAD_token, :].set(0.0)                               # padding_idx row is zero
    k = 1.0 / np.sqrt(H)

    def unif(kk, shape):
        return jax.random.uniform(kk, shape, jnp.float32, -k, k)     # PyTorch GRU default init

    wih_f = unif(ks[1], (n, 3 * H, E))
    whh_f = unif(ks[2], (n, 3 * H, H))
    bih_f = unif(ks[3], (n, 3 * H))
    bhh_f = unif(ks[4], (n, 3 * H))
    wih_b = unif(ks[5], (n, 3 * H, E))
    whh_b = unif(ks[6], (n, 3 * H, H))
    bih_b = unif(ks[7], (n, 3 * H))
    bhh_b = unif(ks[8], (n, 3 * H))
    return dict(
        c=c,
        wih_f=jnp.transpose(wih_f, (0, 2, 1)), whh_f=jnp.transpose(whh_f, (0, 2, 1)),
        bih_f=bih_f[:, None, :], bhh_f=bhh_f[:, None, :],
        wih_b=jnp.transpose(wih_b, (0, 2, 1)), whh_b=jnp.transpose(whh_b, (0, 2, 1)),
        bih_b=bih_b[:, None, :], bhh_b=bhh_b[:, None, :],
    )


if __name__ == "__main__":
    vocab, embedding_dim, hop = 32, 32, 3          # EncoderMemNN(vocab, embedding_dim, hop, ...)
    L, B, M = 8, 2, 4                              # (max_len, batch, mem_token_size)

    key = jax.random.PRNGKey(0)
    k_story, k_params = jax.random.split(key)
    story = jax.random.randint(k_story, (L, B, M), 0, vocab, dtype=jnp.int32)
    params = init_params(k_params, vocab, embedding_dim, hop)

    u_k = jax.block_until_ready(encoder_memnn_forward(story, params, hops=hop))
    ref = jax.block_until_ready(encoder_memnn_reference(story, params, hops=hop))

    assert u_k.shape == (B, embedding_dim)
    np.testing.assert_allclose(np.asarray(u_k), np.asarray(ref), rtol=1e-2, atol=1e-2)
    print("KERNEL_OK")
</pallas_src>

<mosaic_0001>
module attributes {stable_mosaic.version = 11 : i64} {
  func.func @encoder_memnn_kernel(%arg0: memref<16x4xi32, #tpu.memory_space<vmem>>, %arg1: memref<32x384xf32, #tpu.memory_space<vmem>>, %arg2: memref<1x384xf32, #tpu.memory_space<vmem>>, %arg3: memref<128x384xf32, #tpu.memory_space<vmem>>, %arg4: memref<1x384xf32, #tpu.memory_space<vmem>>, %arg5: memref<2x32xf32, #tpu.memory_space<vmem>>) attributes {dimension_semantics = [], scalar_prefetch = 0 : i64, scratch_operands = 0 : i64, tpu.core_type = #tpu.core_type<tc>} {
    %c0 = arith.constant 0 : index
    %c0_0 = arith.constant 0 : index
    %0 = vector.load %arg0[%c0, %c0_0] : memref<16x4xi32, #tpu.memory_space<vmem>>, vector<16x4xi32>
    %1 = tpu.iota {dimensions = array<i32: 2>} : vector<16x4x32xi32>
    %2 = vector.shape_cast %0 : vector<16x4xi32> to vector<16x4x1xi32>
    %3 = vector.broadcast %2 : vector<16x4x1xi32> to vector<16x4x32xi32>
    %4 = arith.cmpi eq, %3, %1 : vector<16x4x32xi32>
    %5 = arith.extui %4 : vector<16x4x32xi1> to vector<16x4x32xi32>
    %6 = arith.sitofp %5 : vector<16x4x32xi32> to vector<16x4x32xf32>
    %cst = arith.constant dense<0.000000e+00> : vector<16x32xf32>
    %7 = vector.multi_reduction <add>, %6, %cst [1] : vector<16x4x32xf32> to vector<16x32xf32>
    %c0_1 = arith.constant 0 : index
    %c0_2 = arith.constant 0 : index
    %8 = vector.load %arg1[%c0_1, %c0_2] : memref<32x384xf32, #tpu.memory_space<vmem>>, vector<32x384xf32>
    %cst_3 = arith.constant dense<0.000000e+00> : vector<16x384xf32>
    %9 = tpu.matmul %7, %8, %cst_3 {dimension_numbers = #tpu.dot_dimension_numbers<[1], [0], [0], [1], [0, 0, 1, 1], [], []>} : vector<16x32xf32>, vector<32x384xf32>, vector<16x384xf32> -> vector<16x384xf32>
    %c0_4 = arith.constant 0 : index
    %c0_5 = arith.constant 0 : index
    %10 = vector.load %arg2[%c0_4, %c0_5] : memref<1x384xf32, #tpu.memory_space<vmem>>, vector<1x384xf32>
    %11 = vector.broadcast %10 : vector<1x384xf32> to vector<16x384xf32>
    %12 = arith.addf %9, %11 : vector<16x384xf32>
    %c0_6 = arith.constant 0 : index
    %c0_7 = arith.constant 0 : index
    %13 = vector.load %arg3[%c0_6, %c0_7] : memref<128x384xf32, #tpu.memory_space<vmem>>, vector<128x384xf32>
    %c0_8 = arith.constant 0 : index
    %c0_9 = arith.constant 0 : index
    %14 = vector.load %arg4[%c0_8, %c0_9] : memref<1x384xf32, #tpu.memory_space<vmem>>, vector<1x384xf32>
    %15 = vector.shape_cast %14 : vector<1x384xf32> to vector<1x384xf32>
    %16 = vector.broadcast %15 : vector<1x384xf32> to vector<8x384xf32>
    %17 = tpu.iota {dimensions = array<i32: 1>} : vector<8x384xi32>
    %c128_i32 = arith.constant 128 : i32
    %c0_i32 = arith.constant 0 : i32
    %18 = arith.cmpi eq, %c128_i32, %c0_i32 : i32
    %c1_i32 = arith.constant 1 : i32
    %19 = arith.select %18, %c1_i32, %c128_i32 : i32
    %20 = vector.broadcast %19 : i32 to vector<8x384xi32>
    %21 = arith.remsi %17, %20 : vector<8x384xi32>
    %c0_i32_10 = arith.constant 0 : i32
    %22 = vector.broadcast %c0_i32_10 : i32 to vector<8x384xi32>
    %23 = arith.cmpi ne, %21, %22 : vector<8x384xi32>
    %c0_i32_11 = arith.constant 0 : i32
    %24 = vector.broadcast %c0_i32_11 : i32 to vector<8x384xi32>
    %25 = arith.cmpi slt, %21, %24 : vector<8x384xi32>
    %c0_i32_12 = arith.constant 0 : i32
    %26 = arith.cmpi slt, %19, %c0_i32_12 : i32
    %27 = vector.broadcast %26 : i1 to vector<8x384xi1>
    %28 = vector.broadcast %27 : vector<8x384xi1> to vector<8x384xi1>
    %29 = arith.xori %25, %28 : vector<8x384xi1>
    %30 = arith.andi %29, %23 : vector<8x384xi1>
    %31 = vector.broadcast %19 : i32 to vector<8x384xi32>
    %32 = arith.addi %21, %31 : vector<8x384xi32>
    %33 = arith.select %30, %32, %21 : vector<8x384xi1>, vector<8x384xi32>
    %c64_i32 = arith.constant 64 : i32
    %34 = vector.broadcast %c64_i32 : i32 to vector<8x384xi32>
    %35 = arith.cmpi slt, %33, %34 : vector<8x384xi32>
    %cst_13 = arith.constant 0.000000e+00 : f32
    %36 = vector.broadcast %cst_13 : f32 to vector<8x128xf32>
    %37 = vector.extract_strided_slice %12 {offsets = [0, 0], sizes = [8, 384], strides = [1, 1]} : vector<16x384xf32> to vector<8x384xf32>
    %38 = vector.extract_strided_slice %12 {offsets = [8, 0], sizes = [8, 384], strides = [1, 1]} : vector<16x384xf32> to vector<8x384xf32>
    %39 = arith.select %35, %37, %38 : vector<8x384xi1>, vector<8x384xf32>
    %cst_14 = arith.constant dense<0.000000e+00> : vector<8x384xf32>
    %40 = tpu.matmul %36, %13, %cst_14 {dimension_numbers = #tpu.dot_dimension_numbers<[1], [0], [0], [1], [0, 0, 1, 1], [], []>} : vector<8x128xf32>, vector<128x384xf32>, vector<8x384xf32> -> vector<8x384xf32>
    %41 = arith.addf %40, %16 : vector<8x384xf32>
    %42 = vector.extract_strided_slice %39 {offsets = [0, 0], sizes = [8, 128], strides = [1, 1]} : vector<8x384xf32> to vector<8x128xf32>
    %43 = vector.extract_strided_slice %41 {offsets = [0, 0], sizes = [8, 128], strides = [1, 1]} : vector<8x384xf32> to vector<8x128xf32>
    %44 = arith.addf %42, %43 : vector<8x128xf32>
    %45 = arith.negf %44 : vector<8x128xf32>
    %46 = math.exp %45 : vector<8x128xf32>
    %cst_15 = arith.constant 1.000000e+00 : f32
    %47 = vector.broadcast %cst_15 : f32 to vector<8x128xf32>
    %48 = arith.addf %47, %46 : vector<8x128xf32>
    %49 = arith.divf %47, %48 : vector<8x128xf32>
    %50 = vector.extract_strided_slice %39 {offsets = [0, 128], sizes = [8, 128], strides = [1, 1]} : vector<8x384xf32> to vector<8x128xf32>
    %51 = vector.extract_strided_slice %41 {offsets = [0, 128], sizes = [8, 128], strides = [1, 1]} : vector<8x384xf32> to vector<8x128xf32>
    %52 = arith.addf %50, %51 : vector<8x128xf32>
    %53 = arith.negf %52 : vector<8x128xf32>
    %54 = math.exp %53 : vector<8x128xf32>
    %cst_16 = arith.constant 1.000000e+00 : f32
    %55 = vector.broadcast %cst_16 : f32 to vector<8x128xf32>
    %56 = arith.addf %55, %54 : vector<8x128xf32>
    %57 = arith.divf %55, %56 : vector<8x128xf32>
    %58 = vector.extract_strided_slice %39 {offsets = [0, 256], sizes = [8, 128], strides = [1, 1]} : vector<8x384xf32> to vector<8x128xf32>
    %59 = vector.extract_strided_slice %41 {offsets = [0, 256], sizes = [8, 128], strides = [1, 1]} : vector<8x384xf32> to vector<8x128xf32>
    %60 = arith.mulf %49, %59 : vector<8x128xf32>
    %61 = arith.addf %58, %60 : vector<8x128xf32>
    %62 = math.tanh %61 : vector<8x128xf32>
    %cst_17 = arith.constant 1.000000e+00 : f32
    %63 = vector.broadcast %cst_17 : f32 to vector<8x128xf32>
    %64 = arith.subf %63, %57 : vector<8x128xf32>
    %65 = arith.mulf %64, %62 : vector<8x128xf32>
    %66 = arith.mulf %57, %36 : vector<8x128xf32>
    %67 = arith.addf %65, %66 : vector<8x128xf32>
    %68 = vector.extract_strided_slice %67 {offsets = [0, 0], sizes = [8, 64], strides = [1, 1]} : vector<8x128xf32> to vector<8x64xf32>
    %69 = vector.extract_strided_slice %67 {offsets = [0, 64], sizes = [8, 64], strides = [1, 1]} : vector<8x128xf32> to vector<8x64xf32>
    %70 = vector.extract_strided_slice %12 {offsets = [8, 0], sizes = [8, 384], strides = [1, 1]} : vector<16x384xf32> to vector<8x384xf32>
    %71 = vector.extract_strided_slice %12 {offsets = [0, 0], sizes = [8, 384], strides = [1, 1]} : vector<16x384xf32> to vector<8x384xf32>
    %72 = arith.select %35, %70, %71 : vector<8x384xi1>, vector<8x384xf32>
    %cst_18 = arith.constant dense<0.000000e+00> : vector<8x384xf32>
    %73 = tpu.matmul %67, %13, %cst_18 {dimension_numbers = #tpu.dot_dimension_numbers<[1], [0], [0], [1], [0, 0, 1, 1], [], []>} : vector<8x128xf32>, vector<128x384xf32>, vector<8x384xf32> -> vector<8x384xf32>
    %74 = arith.addf %73, %16 : vector<8x384xf32>
    %75 = vector.extract_strided_slice %72 {offsets = [0, 0], sizes = [8, 128], strides = [1, 1]} : vector<8x384xf32> to vector<8x128xf32>
    %76 = vector.extract_strided_slice %74 {offsets = [0, 0], sizes = [8, 128], strides = [1, 1]} : vector<8x384xf32> to vector<8x128xf32>
    %77 = arith.addf %75, %76 : vector<8x128xf32>
    %78 = arith.negf %77 : vector<8x128xf32>
    %79 = math.exp %78 : vector<8x128xf32>
    %cst_19 = arith.constant 1.000000e+00 : f32
    %80 = vector.broadcast %cst_19 : f32 to vector<8x128xf32>
    %81 = arith.addf %80, %79 : vector<8x128xf32>
    %82 = arith.divf %80, %81 : vector<8x128xf32>
    %83 = vector.extract_strided_slice %72 {offsets = [0, 128], sizes = [8, 128], strides = [1, 1]} : vector<8x384xf32> to vector<8x128xf32>
    %84 = vector.extract_strided_slice %74 {offsets = [0, 128], sizes = [8, 128], strides = [1, 1]} : vector<8x384xf32> to vector<8x128xf32>
    %85 = arith.addf %83, %84 : vector<8x128xf32>
    %86 = arith.negf %85 : vector<8x128xf32>
    %87 = math.exp %86 : vector<8x128xf32>
    %cst_20 = arith.constant 1.000000e+00 : f32
    %88 = vector.broadcast %cst_20 : f32 to vector<8x128xf32>
    %89 = arith.addf %88, %87 : vector<8x128xf32>
    %90 = arith.divf %88, %89 : vector<8x128xf32>
    %91 = vector.extract_strided_slice %72 {offsets = [0, 256], sizes = [8, 128], strides = [1, 1]} : vector<8x384xf32> to vector<8x128xf32>
    %92 = vector.extract_strided_slice %74 {offsets = [0, 256], sizes = [8, 128], strides = [1, 1]} : vector<8x384xf32> to vector<8x128xf32>
    %93 = arith.mulf %82, %92 : vector<8x128xf32>
    %94 = arith.addf %91, %93 : vector<8x128xf32>
    %95 = math.tanh %94 : vector<8x128xf32>
    %cst_21 = arith.constant 1.000000e+00 : f32
    %96 = vector.broadcast %cst_21 : f32 to vector<8x128xf32>
    %97 = arith.subf %96, %90 : vector<8x128xf32>
    %98 = arith.mulf %97, %95 : vector<8x128xf32>
    %99 = arith.mulf %90, %67 : vector<8x128xf32>
    %100 = arith.addf %98, %99 : vector<8x128xf32>
    %101 = vector.extract_strided_slice %100 {offsets = [0, 0], sizes = [8, 64], strides = [1, 1]} : vector<8x128xf32> to vector<8x64xf32>
    %102 = vector.extract_strided_slice %100 {offsets = [0, 64], sizes = [8, 64], strides = [1, 1]} : vector<8x128xf32> to vector<8x64xf32>
    %103 = tpu.concatenate %68, %101 in 0 : vector<8x64xf32>, vector<8x64xf32> -> vector<16x64xf32>
    %104 = vector.shape_cast %103 : vector<16x64xf32> to vector<2x8x64xf32>
    %105 = tpu.concatenate %102, %69 in 0 : vector<8x64xf32>, vector<8x64xf32> -> vector<16x64xf32>
    %106 = vector.shape_cast %105 : vector<16x64xf32> to vector<2x8x64xf32>
    %cst_22 = arith.constant 0.000000e+00 : f32
    %107 = vector.broadcast %cst_22 : f32 to vector<2x16xf32>
    %cst_23 = arith.constant 0.000000e+00 : f32
    %108 = vector.broadcast %cst_23 : f32 to vector<2x16xf32>
    %109 = vector.extract_strided_slice %104 {offsets = [0, 0, 0], sizes = [2, 8, 16], strides = [1, 1, 1]} : vector<2x8x64xf32> to vector<2x8x16xf32>
    %110 = vector.extract_strided_slice %106 {offsets = [0, 0, 0], sizes = [2, 8, 16], strides = [1, 1, 1]} : vector<2x8x64xf32> to vector<2x8x16xf32>
    %111 = vector.extract_strided_slice %104 {offsets = [0, 0, 16], sizes = [2, 8, 16], strides = [1, 1, 1]} : vector<2x8x64xf32> to vector<2x8x16xf32>
    %112 = vector.extract_strided_slice %106 {offsets = [0, 0, 16], sizes = [2, 8, 16], strides = [1, 1, 1]} : vector<2x8x64xf32> to vector<2x8x16xf32>
    %113 = vector.shape_cast %107 : vector<2x16xf32> to vector<2x1x16xf32>
    %114 = vector.broadcast %113 : vector<2x1x16xf32> to vector<2x8x16xf32>
    %115 = arith.mulf %109, %114 : vector<2x8x16xf32>
    %cst_24 = arith.constant dense<0.000000e+00> : vector<2x8xf32>
    %116 = vector.multi_reduction <add>, %115, %cst_24 [2] : vector<2x8x16xf32> to vector<2x8xf32>
    %117 = vector.shape_cast %108 : vector<2x16xf32> to vector<2x1x16xf32>
    %118 = vector.broadcast %117 : vector<2x1x16xf32> to vector<2x8x16xf32>
    %119 = arith.mulf %110, %118 : vector<2x8x16xf32>
    %cst_25 = arith.constant dense<0.000000e+00> : vector<2x8xf32>
    %120 = vector.multi_reduction <add>, %119, %cst_25 [2] : vector<2x8x16xf32> to vector<2x8xf32>
    %121 = arith.addf %116, %120 : vector<2x8xf32>
    %cst_26 = arith.constant dense<0xFF800000> : vector<2xf32>
    %122 = vector.multi_reduction <maximumf>, %121, %cst_26 [1] : vector<2x8xf32> to vector<2xf32>
    %123 = vector.shape_cast %122 : vector<2xf32> to vector<2x1xf32>
    %124 = vector.broadcast %123 : vector<2x1xf32> to vector<2x8xf32>
    %125 = arith.subf %121, %124 : vector<2x8xf32>
    %126 = math.exp %125 : vector<2x8xf32>
    %cst_27 = arith.constant dense<0.000000e+00> : vector<2xf32>
    %127 = vector.multi_reduction <add>, %126, %cst_27 [1] : vector<2x8xf32> to vector<2xf32>
    %128 = vector.shape_cast %127 : vector<2xf32> to vector<2x1xf32>
    %129 = vector.broadcast %128 : vector<2x1xf32> to vector<2x8xf32>
    %130 = arith.divf %126, %129 : vector<2x8xf32>
    %131 = vector.shape_cast %130 : vector<2x8xf32> to vector<2x8x1xf32>
    %132 = vector.broadcast %131 : vector<2x8x1xf32> to vector<2x8x16xf32>
    %133 = arith.mulf %132, %111 : vector<2x8x16xf32>
    %cst_28 = arith.constant dense<0.000000e+00> : vector<2x16xf32>
    %134 = vector.multi_reduction <add>, %133, %cst_28 [1] : vector<2x8x16xf32> to vector<2x16xf32>
    %135 = arith.addf %107, %134 : vector<2x16xf32>
    %136 = vector.shape_cast %130 : vector<2x8xf32> to vector<2x8x1xf32>
    %137 = vector.broadcast %136 : vector<2x8x1xf32> to vector<2x8x16xf32>
    %138 = arith.mulf %137, %112 : vector<2x8x16xf32>
    %cst_29 = arith.constant dense<0.000000e+00> : vector<2x16xf32>
    %139 = vector.multi_reduction <add>, %138, %cst_29 [1] : vector<2x8x16xf32> to vector<2x16xf32>
    %140 = arith.addf %108, %139 : vector<2x16xf32>
    %141 = vector.extract_strided_slice %104 {offsets = [0, 0, 16], sizes = [2, 8, 16], strides = [1, 1, 1]} : vector<2x8x64xf32> to vector<2x8x16xf32>
    %142 = vector.extract_strided_slice %106 {offsets = [0, 0, 16], sizes = [2, 8, 16], strides = [1, 1, 1]} : vector<2x8x64xf32> to vector<2x8x16xf32>
    %143 = vector.extract_strided_slice %104 {offsets = [0, 0, 32], sizes = [2, 8, 16], strides = [1, 1, 1]} : vector<2x8x64xf32> to vector<2x8x16xf32>
    %144 = vector.extract_strided_slice %106 {offsets = [0, 0, 32], sizes = [2, 8, 16], strides = [1, 1, 1]} : vector<2x8x64xf32> to vector<2x8x16xf32>
    %145 = vector.shape_cast %135 : vector<2x16xf32> to vector<2x1x16xf32>
    %146 = vector.broadcast %145 : vector<2x1x16xf32> to vector<2x8x16xf32>
    %147 = arith.mulf %141, %146 : vector<2x8x16xf32>
    %cst_30 = arith.constant dense<0.000000e+00> : vector<2x8xf32>
    %148 = vector.multi_reduction <add>, %147, %cst_30 [2] : vector<2x8x16xf32> to vector<2x8xf32>
    %149 = vector.shape_cast %140 : vector<2x16xf32> to vector<2x1x16xf32>
    %150 = vector.broadcast %149 : vector<2x1x16xf32> to vector<2x8x16xf32>
    %151 = arith.mulf %142, %150 : vector<2x8x16xf32>
    %cst_31 = arith.constant dense<0.000000e+00> : vector<2x8xf32>
    %152 = vector.multi_reduction <add>, %151, %cst_31 [2] : vector<2x8x16xf32> to vector<2x8xf32>
    %153 = arith.addf %148, %152 : vector<2x8xf32>
    %cst_32 = arith.constant dense<0xFF800000> : vector<2xf32>
    %154 = vector.multi_reduction <maximumf>, %153, %cst_32 [1] : vector<2x8xf32> to vector<2xf32>
    %155 = vector.shape_cast %154 : vector<2xf32> to vector<2x1xf32>
    %156 = vector.broadcast %155 : vector<2x1xf32> to vector<2x8xf32>
    %157 = arith.subf %153, %156 : vector<2x8xf32>
    %158 = math.exp %157 : vector<2x8xf32>
    %cst_33 = arith.constant dense<0.000000e+00> : vector<2xf32>
    %159 = vector.multi_reduction <add>, %158, %cst_33 [1] : vector<2x8xf32> to vector<2xf32>
    %160 = vector.shape_cast %159 : vector<2xf32> to vector<2x1xf32>
    %161 = vector.broadcast %160 : vector<2x1xf32> to vector<2x8xf32>
    %162 = arith.divf %158, %161 : vector<2x8xf32>
    %163 = vector.shape_cast %162 : vector<2x8xf32> to vector<2x8x1xf32>
    %164 = vector.broadcast %163 : vector<2x8x1xf32> to vector<2x8x16xf32>
    %165 = arith.mulf %164, %143 : vector<2x8x16xf32>
    %cst_34 = arith.constant dense<0.000000e+00> : vector<2x16xf32>
    %166 = vector.multi_reduction <add>, %165, %cst_34 [1] : vector<2x8x16xf32> to vector<2x16xf32>
    %167 = arith.addf %135, %166 : vector<2x16xf32>
    %168 = vector.shape_cast %162 : vector<2x8xf32> to vector<2x8x1xf32>
    %169 = vector.broadcast %168 : vector<2x8x1xf32> to vector<2x8x16xf32>
    %170 = arith.mulf %169, %144 : vector<2x8x16xf32>
    %cst_35 = arith.constant dense<0.000000e+00> : vector<2x16xf32>
    %171 = vector.multi_reduction <add>, %170, %cst_35 [1] : vector<2x8x16xf32> to vector<2x16xf32>
    %172 = arith.addf %140, %171 : vector<2x16xf32>
    %173 = vector.extract_strided_slice %104 {offsets = [0, 0, 32], sizes = [2, 8, 16], strides = [1, 1, 1]} : vector<2x8x64xf32> to vector<2x8x16xf32>
    %174 = vector.extract_strided_slice %106 {offsets = [0, 0, 32], sizes = [2, 8, 16], strides = [1, 1, 1]} : vector<2x8x64xf32> to vector<2x8x16xf32>
    %175 = vector.extract_strided_slice %104 {offsets = [0, 0, 48], sizes = [2, 8, 16], strides = [1, 1, 1]} : vector<2x8x64xf32> to vector<2x8x16xf32>
    %176 = vector.extract_strided_slice %106 {offsets = [0, 0, 48], sizes = [2, 8, 16], strides = [1, 1, 1]} : vector<2x8x64xf32> to vector<2x8x16xf32>
    %177 = vector.shape_cast %167 : vector<2x16xf32> to vector<2x1x16xf32>
    %178 = vector.broadcast %177 : vector<2x1x16xf32> to vector<2x8x16xf32>
    %179 = arith.mulf %173, %178 : vector<2x8x16xf32>
    %cst_36 = arith.constant dense<0.000000e+00> : vector<2x8xf32>
    %180 = vector.multi_reduction <add>, %179, %cst_36 [2] : vector<2x8x16xf32> to vector<2x8xf32>
    %181 = vector.shape_cast %172 : vector<2x16xf32> to vector<2x1x16xf32>
    %182 = vector.broadcast %181 : vector<2x1x16xf32> to vector<2x8x16xf32>
    %183 = arith.mulf %174, %182 : vector<2x8x16xf32>
    %cst_37 = arith.constant dense<0.000000e+00> : vector<2x8xf32>
    %184 = vector.multi_reduction <add>, %183, %cst_37 [2] : vector<2x8x16xf32> to vector<2x8xf32>
    %185 = arith.addf %180, %184 : vector<2x8xf32>
    %cst_38 = arith.constant dense<0xFF800000> : vector<2xf32>
    %186 = vector.multi_reduction <maximumf>, %185, %cst_38 [1] : vector<2x8xf32> to vector<2xf32>
    %187 = vector.shape_cast %186 : vector<2xf32> to vector<2x1xf32>
    %188 = vector.broadcast %187 : vector<2x1xf32> to vector<2x8xf32>
    %189 = arith.subf %185, %188 : vector<2x8xf32>
    %190 = math.exp %189 : vector<2x8xf32>
    %cst_39 = arith.constant dense<0.000000e+00> : vector<2xf32>
    %191 = vector.multi_reduction <add>, %190, %cst_39 [1] : vector<2x8xf32> to vector<2xf32>
    %192 = vector.shape_cast %191 : vector<2xf32> to vector<2x1xf32>
    %193 = vector.broadcast %192 : vector<2x1xf32> to vector<2x8xf32>
    %194 = arith.divf %190, %193 : vector<2x8xf32>
    %195 = vector.shape_cast %194 : vector<2x8xf32> to vector<2x8x1xf32>
    %196 = vector.broadcast %195 : vector<2x8x1xf32> to vector<2x8x16xf32>
    %197 = arith.mulf %196, %175 : vector<2x8x16xf32>
    %cst_40 = arith.constant dense<0.000000e+00> : vector<2x16xf32>
    %198 = vector.multi_reduction <add>, %197, %cst_40 [1] : vector<2x8x16xf32> to vector<2x16xf32>
    %199 = arith.addf %167, %198 : vector<2x16xf32>
    %200 = vector.shape_cast %194 : vector<2x8xf32> to vector<2x8x1xf32>
    %201 = vector.broadcast %200 : vector<2x8x1xf32> to vector<2x8x16xf32>
    %202 = arith.mulf %201, %176 : vector<2x8x16xf32>
    %cst_41 = arith.constant dense<0.000000e+00> : vector<2x16xf32>
    %203 = vector.multi_reduction <add>, %202, %cst_41 [1] : vector<2x8x16xf32> to vector<2x16xf32>
    %204 = arith.addf %172, %203 : vector<2x16xf32>
    %205 = tpu.concatenate %199, %204 in 1 : vector<2x16xf32>, vector<2x16xf32> -> vector<2x32xf32>
    %c0_42 = arith.constant 0 : index
    %c0_43 = arith.constant 0 : index
    %206 = vector.load %arg5[%c0_42, %c0_43] : memref<2x32xf32, #tpu.memory_space<vmem>>, vector<2x32xf32>
    tpu.vector_store %arg5[%c0_42, %c0_43], %205 {strides = array<i32>} : memref<2x32xf32, #tpu.memory_space<vmem>>, vector<2x32xf32>,
    return
  }
}

</mosaic_0001>

<bundles_post_ra>
// kernel: tpu_custom_call.1
= control target key start
LH: loop header
LB: loop body
LE: loop exit
PB: predicated region body
PF: predicated region fallthrough
CT: control target
= control target key end

     0   :  { %10 = vsyncpa [#allocation3], 0  ;;  %s2388_s0 = inlined_call_operand.vmem [shape: s32[16,4], index: 0, kind: input, shape index: {}]   ;;  %s2389_s1 = inlined_call_operand.hbm [shape: f32[32,384], index: 1, kind: input, shape index: {}]   ;;  %s2390_s2 = inlined_call_operand.vmem [shape: f32[1,384], index: 2, kind: input, shape index: {}]   ;;  %s2391_s3 = inlined_call_operand.hbm [shape: f32[128,384], index: 3, kind: input, shape index: {}]   ;;  %s2392_s4 = inlined_call_operand.vmem [shape: f32[1,384], index: 4, kind: input, shape index: {}]   ;;  %s2393_s5 = inlined_call_operand.hbm [shape: f32[2,32], index: 5, kind: output, shape index: {}]  }
   0x1   :  { %11 = vsyncpa [#allocation6], 0 }
   0x2   :  { %12 = vsyncpa [#allocation4], 0  ;;  %s1930_s18 = smov [#allocation2]   ;;  %s1858_s22 = scalar_lea.hbm %s2389_s1, 1536 }
   0x3   :  { %s20_s19 = sshll.u32 %s1930_s18, 4  ;;  %p1859_p0 = scmp.ne.s32.totalorder %s2389_s1, %s1858_s22  ;;  %s21_s19 = int_to_ptr.vmem [resolvable:$true] %s20_s19 }
   0x4   :  { %p1862_p1 = scmp.lt.u32.totalorder %s1858_s22, %s2389_s1 }
   0x6   :  { %p1864_p2 = pnand %p1862_p1, %p1859_p0 }
   0x8   :  { %1867 = shalt.err (!%p1864_p2)
}
   0x9   :  { %s1868_s27 = scalar_lea.vmem %s21_s19, 1536  ;;  %p1873_p4 = scmp.lt.s32.totalorder %s21_s19, %s21_s19 }
   0xa   :  { %p1869_p3 = scmp.ne.s32.totalorder %s21_s19, %s1868_s27  ;;  %p1874_p5 = scmp.lt.s32.totalorder %s1868_s27, %s1868_s27 }
   0xc   :  { %p1875_p6 = por %p1874_p5, %p1873_p4 }
   0xe   :  { %p1876_p7 = pnand %p1875_p6, %p1869_p3 }
  0x10   :  { %1879 = shalt.err (!%p1876_p7)
}
  0x11   :  { %s1931_s28 = smov 384   ;;  %s1932_s29 = smov 24  }
  0x12   :  { %26 = dma.hbm_to_vmem [thread:$0]  %s2389_s1, 1536, %s21_s19, [#allocation3], %s1931_s28, %s1931_s28, %s1932_s29  }
  0x13   :  { %s1933_s7 = smov [#allocation5]   ;;  %s1880_s11 = scalar_lea.hbm %s2391_s3, 6144 }
  0x14   :  { %s34_s8 = sshll.u32 %s1933_s7, 4  ;;  %p1881_p8 = scmp.ne.s32.totalorder %s2391_s3, %s1880_s11  ;;  %s35_s8 = int_to_ptr.vmem [resolvable:$true] %s34_s8 }
  0x15   :  { %p1884_p9 = scmp.lt.u32.totalorder %s1880_s11, %s2391_s3 }
  0x17   :  { %p1886_p10 = pnand %p1884_p9, %p1881_p8 }
  0x19   :  { %1889 = shalt.err (!%p1886_p10)
}
  0x1a   :  { %s1890_s16 = scalar_lea.vmem %s35_s8, 6144  ;;  %p1895_p12 = scmp.lt.s32.totalorder %s35_s8, %s35_s8 }
  0x1b   :  { %p1891_p11 = scmp.ne.s32.totalorder %s35_s8, %s1890_s16  ;;  %p1896_p13 = scmp.lt.s32.totalorder %s1890_s16, %s1890_s16 }
  0x1d   :  { %p1897_p0 = por %p1896_p13, %p1895_p12 }
  0x1f   :  { %p1898_p1 = pnand %p1897_p0, %p1891_p11 }
  0x21   :  { %1901 = shalt.err (!%p1898_p1)
}
  0x22   :  { %40 = dma.hbm_to_vmem [thread:$0]  %s2391_s3, 6144, %s35_s8, [#allocation6], %s1931_s28, %s1931_s28, %s1932_s29  }
  0x23   :  { %1924 = dma.done.wait [#allocation3], 1536  }
  0x24   :  { %1925 = vsyncadd [#allocation3], 4294965760 }
  0x25   :  { %1926 = dma.done.wait [#allocation6], 6144  }
  0x26   :  { %1927 = vsyncadd [#allocation6], 4294961152  ;;  %v51_v0 = vlaneseq  ;;  %v1934_v1 = vmov 0.0   ;;  %v49_v7 = vld [vmem:[%s2388_s0] sm:$0xff]  ;;  %v327_v18 = vld [vmem:[#allocation2 + $0x8] sm:$0xff]  ;;  %v1935_v50 = vmov 0.0|0.0  }
  0x27   :  { %461 = vmatprep.mubr.f32.mxu0 %v1934_v1  ;;  %v330_v19 = vld [vmem:[#allocation2 + $0x20] sm:$0xff]  ;;  %v329_v24 = vld [vmem:[#allocation2 + $0x18] sm:$0xff]  ;;  %v50_v25 = vld [vmem:[%s2388_s0 + $0x8] sm:$0xff]  ;;  %vm213_vm0 = vcmask 257024   ;;  %vm371_vm7 = vcmask 1041409   ;;  %vm373_vm8 = vcmask 1042434  }
  0x28   :  { %v2001_v2 = vshrl.u32 %v51_v0, 7  ;;  %v1669_v22 = vpack.c.bf16 %v330_v19, %v327_v18  ;;  %v326_v23 = vld [vmem:[#allocation2] sm:$0xff]  ;;  %v333_v27 = vld [vmem:[#allocation2 + $0x38] sm:$0xff]  ;;  %v336_v28 = vld [vmem:[#allocation2 + $0x50] sm:$0xff]  ;;  %v2034_v51 = vand.u32 127, %v51_v0  ;;  %vm375_vm15 = vcmask 1043459  }
  0x29   :  { %v1671_v26 = vpack.c.bf16 %v329_v24, %v326_v23  ;;  %v1673_v31 = vpack.c.bf16 %v336_v28, %v333_v27  ;;  %v332_v32 = vld [vmem:[#allocation2 + $0x30] sm:$0xff]  ;;  %v335_v33 = vld [vmem:[#allocation2 + $0x48] sm:$0xff]  ;;  %v553_v36 = vld [vmem:[#allocation5 + $0x20] sm:$0xff]  ;;  %s1939_s23 = smov 112   ;;  %s1940_s24 = smov 48  }
  0x2a   :  { %v2004_v3 = vsub.s32 0, %v2001_v2  ;;  %v2007_v4 = vsub.s32 2, %v2001_v2  ;;  %v76_v5 = vsub.s32 3, %v2001_v2  ;;  %v2011_v6 = vsub.s32 1, %v2001_v2  ;;  %1670 = vmatprep.subr.bf16.mxu0 %v1669_v22  ;;  %v550_v35 = vld [vmem:[#allocation5 + $0x8] sm:$0xff]  ;;  %v328_v44 = vld [vmem:[#allocation2 + $0x10] sm:$0xff] }
  0x2b   :  { %v90_v12 = vsub.s32 5, %v2001_v2  ;;  %v83_v13 = vsub.s32 4, %v2001_v2  ;;  %v104_v16 = vsub.s32 7, %v2001_v2  ;;  %v97_v17 = vsub.s32 6, %v2001_v2  ;;  %1672 = vmatpush1.bf16.msra.mxu0 %v1671_v26  ;;  %v331_v45 = vld [vmem:[#allocation2 + $0x28] sm:$0xff]  ;;  %v334_v47 = vld [vmem:[#allocation2 + $0x40] sm:$0xff] }
  0x2c   :  { %v70_v8 = vrot.slane %v49_v7, %v2007_v4  ;;  %v56_v9 = vrot.slane %v49_v7, %v2004_v3  ;;  %v77_v10 = vrot.slane %v49_v7, %v76_v5  ;;  %v63_v11 = vrot.slane %v49_v7, %v2011_v6  ;;  %1674 = vmatprep.subr.bf16.mxu0 %v1673_v31  ;;  %v337_v48 = vld [vmem:[#allocation2 + $0x58] sm:$0xff]  ;;  %s1941_s25 = smov 16   ;;  %s1942_s26 = smov 96  }
  0x2d   :  { %v91_v14 = vrot.slane %v49_v7, %v90_v12  ;;  %v84_v15 = vrot.slane %v49_v7, %v83_v13  ;;  %v105_v20 = vrot.slane %v49_v7, %v104_v16  ;;  %v98_v21 = vrot.slane %v49_v7, %v97_v17  ;;  %s1943_s27 = smov 32   ;;  %s1944_s28 = smov [#allocation7]  }
  0x2e   :  { %72 = vbcast.lane.b32.xlu1 %v70_v8, 256  ;;  %58 = vbcast.lane.b32.xlu0 %v56_v9, 256  ;;  %v112_v29 = vrot.slane %v50_v25, %v2004_v3  ;;  %v119_v30 = vrot.slane %v50_v25, %v2011_v6  ;;  %v1675_v34 = vpack.c.bf16 %v335_v33, %v332_v32  ;;  %s1514_s29 = sshll.u32 %s1944_s28, 4  ;;  %s1515_s29 = int_to_ptr.vmem [resolvable:$true] %s1514_s29 }
  0x2f   :  { %v126_v37 = vrot.slane %v50_v25, %v2007_v4  ;;  %v133_v38 = vrot.slane %v50_v25, %v76_v5  ;;  %v2029_v39 = vpack.c.bf16 %v553_v36, %v550_v35  ;;  %v140_v40 = vrot.slane %v50_v25, %v83_v13  ;;  %s1902_s30 = scalar_lea.vmem %s1515_s29, 32  ;;  %p1907_p3 = scmp.lt.s32.totalorder %s1515_s29, %s1515_s29 }
  0x30   :  { %1676 = vmatpush1.bf16.msra.mxu0 %v1675_v34  ;;  %v147_v41 = vrot.slane %v50_v25, %v90_v12  ;;  %v154_v42 = vrot.slane %v50_v25, %v97_v17  ;;  %v161_v43 = vrot.slane %v50_v25, %v104_v16  ;;  %v1677_v46 = vpack.c.bf16 %v331_v45, %v328_v44  ;;  %v552_v16 = vld [vmem:[#allocation5 + $0x18] sm:$0xff]  ;;  %p1903_p2 = scmp.ne.s32.totalorder %s1515_s29, %s1902_s30  ;;  %p1908_p4 = scmp.lt.s32.totalorder %s1902_s30, %s1902_s30 }
  0x31   :  { %1686 = vmatprep.subr.bf16.mxu0 %v2029_v39  ;;  %v1681_v49 = vpack.c.bf16 %v337_v48, %v334_v47 }
  0x32   :  { %79 = vbcast.lane.b32.xlu1 %v77_v10, 256  ;;  %65 = vbcast.lane.b32.xlu0 %v63_v11, 256  ;;  %p1909_p5 = por %p1908_p4, %p1907_p3 }
  0x33   :  { %1678 = vmatprep.subr.bf16.mxu1 %v1677_v46 }
  0x34   :  { %1680 = vmatpush3.bf16.msra.mxu1 %v1677_v46  ;;  %p1910_p6 = pnand %p1909_p5, %p1903_p2 }
  0x35   :  { %1682 = vmatprep.subr.bf16.mxu1 %v1681_v49 }
  0x36   :  { %93 = vbcast.lane.b32.xlu1 %v91_v14, 256  ;;  %86 = vbcast.lane.b32.xlu0 %v84_v15, 256  ;;  %v549_v15 = vld [vmem:[#allocation5] sm:$0xff] }
  0x37   :  { %v2052_v28 = vpack.c.bf16 %v552_v16, %v549_v15 }
  0x38   :  { %1684 = vmatpush3.bf16.msra.mxu1 %v1681_v49 }
  0x39   :  { %1717 = vmatprep.subr.bf16.mxu1 %v1935_v50 }
  0x3a   :  { %107 = vbcast.lane.b32.xlu1 %v105_v20, 256  ;;  %100 = vbcast.lane.b32.xlu0 %v98_v21, 256 }
  0x3e   :  { %114 = vbcast.lane.b32.xlu0 %v112_v29, 256  ;;  %121 = vbcast.lane.b32.xlu1 %v119_v30, 256 }
  0x42   :  { %128 = vbcast.lane.b32.xlu0 %v126_v37, 256  ;;  %135 = vbcast.lane.b32.xlu1 %v133_v38, 256 }
  0x46   :  { %142 = vbcast.lane.b32.xlu0 %v140_v40, 256  ;;  %149 = vbcast.lane.b32.xlu1 %v147_v41, 256 }
  0x4a   :  { %156 = vbcast.lane.b32.xlu0 %v154_v42, 256  ;;  %163 = vbcast.lane.b32.xlu1 %v161_v43, 256 }
  0xa0   :  { %v73_v52 = vpop.permute.xlu1 %72  ;;  %v59_v53 = vpop.permute.xlu0 %58 }
  0xa1   :  { %vm167_vm1 = vcmp.eq.s32.totalorder %v73_v52, %v2034_v51  ;;  %vm165_vm2 = vcmp.eq.s32.totalorder %v59_v53, %v2034_v51 }
  0xa2   :  { %v1526_v54 = vsel %vm167_vm1, 1.0, %v1934_v1  ;;  %v1524_v55 = vsel %vm165_vm2, 1.0, %v1934_v1  ;;  %vm377_vm2 = vcmask 1044484  }
  0xa3   :  { %v228_v56 = vsel %vm213_vm0, %v1526_v54, 0.0  ;;  %v214_v57 = vsel %vm213_vm0, %v1524_v55, 0.0 }
  0xa4   :  { %v229_v58 = vrot.slane %v228_v56, 4  ;;  %v215_v59 = vrot.slane %v214_v57, 4  ;;  %v80_v60 = vpop.permute.xlu1 %79  ;;  %v66_v61 = vpop.permute.xlu0 %65 }
  0xa5   :  { %vm168_vm3 = vcmp.eq.s32.totalorder %v80_v60, %v2034_v51  ;;  %vm166_vm4 = vcmp.eq.s32.totalorder %v66_v61, %v2034_v51 }
  0xa6   :  { %v230_v62 = vadd.f32 %v229_v58, %v228_v56  ;;  %v216_v63 = vadd.f32 %v215_v59, %v214_v57  ;;  %v1527_v0 = vsel %vm168_vm3, 1.0, %v1934_v1  ;;  %v1525_v5 = vsel %vm166_vm4, 1.0, %v1934_v1 }
  0xa7   :  { %v235_v7 = vsel %vm213_vm0, %v1527_v0, 0.0  ;;  %v221_v8 = vsel %vm213_vm0, %v1525_v5, 0.0  ;;  %vm379_vm4 = vcmask 1045509  }
  0xa8   :  { %v231_v9 = vrot.slane %v230_v62, 2  ;;  %v217_v10 = vrot.slane %v216_v63, 2  ;;  %v236_v11 = vrot.slane %v235_v7, 4  ;;  %v222_v12 = vrot.slane %v221_v8, 4  ;;  %v94_v13 = vpop.permute.xlu1 %93  ;;  %v87_v14 = vpop.permute.xlu0 %86 }
  0xa9   :  { %vm170_vm5 = vcmp.eq.s32.totalorder %v94_v13, %v2034_v51  ;;  %vm169_vm6 = vcmp.eq.s32.totalorder %v87_v14, %v2034_v51 }
  0xaa   :  { %v232_v17 = vadd.f32 %v231_v9, %v230_v62  ;;  %v218_v18 = vadd.f32 %v217_v10, %v216_v63  ;;  %v237_v19 = vadd.f32 %v236_v11, %v235_v7  ;;  %v223_v20 = vadd.f32 %v222_v12, %v221_v8 }
  0xab   :  { %v1529_v21 = vsel %vm170_vm5, 1.0, %v1934_v1  ;;  %v1528_v22 = vsel %vm169_vm6, 1.0, %v1934_v1  ;;  %vm381_vm5 = vcmask 1046534   ;;  %vm383_vm6 = vcmask 1047559  }
  0xac   :  { %v233_v23 = vrot.slane %v232_v17, 1  ;;  %v238_v24 = vrot.slane %v237_v19, 2  ;;  %v224_v25 = vrot.slane %v223_v20, 2  ;;  %v108_v26 = vpop.permute.xlu1 %107  ;;  %v101_v27 = vpop.permute.xlu0 %100  ;;  %v249_v29 = vsel %vm213_vm0, %v1529_v21, 0.0 }
  0xad   :  { %v242_v30 = vsel %vm213_vm0, %v1528_v22, 0.0  ;;  %vm172_vm9 = vcmp.eq.s32.totalorder %v108_v26, %v2034_v51  ;;  %vm171_vm10 = vcmp.eq.s32.totalorder %v101_v27, %v2034_v51  ;;  %v219_v32 = vrot.slane %v218_v18, 1 }
  0xae   :  { %v234_v31 = vadd.f32 %v233_v23, %v232_v17  ;;  %v239_v33 = vadd.f32 %v238_v24, %v237_v19  ;;  %v225_v34 = vadd.f32 %v224_v25, %v223_v20  ;;  %v250_v35 = vrot.slane %v249_v29, 4 }
  0xaf   :  { %v243_v36 = vrot.slane %v242_v30, 4  ;;  %v1531_v37 = vsel %vm172_vm9, 1.0, %v1934_v1  ;;  %v1530_v38 = vsel %vm171_vm10, 1.0, %v1934_v1  ;;  %v220_v52 = vadd.f32 %v219_v32, %v218_v18 }
  0xb0   :  { %v240_v40 = vrot.slane %v239_v33, 1  ;;  %v226_v41 = vrot.slane %v225_v34, 1  ;;  %v263_v42 = vsel %vm213_vm0, %v1531_v37, 0.0  ;;  %v256_v43 = vsel %vm213_vm0, %v1530_v38, 0.0  ;;  %v115_v44 = vpop.permute.xlu0 %114  ;;  %v122_v45 = vpop.permute.xlu1 %121 }
  0xb1   :  { %v251_v46 = vadd.f32 %v250_v35, %v249_v29  ;;  %v244_v47 = vadd.f32 %v243_v36, %v242_v30  ;;  %v264_v48 = vrot.slane %v263_v42, 4  ;;  %v257_v49 = vrot.slane %v256_v43, 4 }
  0xb2   :  { %v227_v53 = vadd.f32 %v226_v41, %v225_v34  ;;  %vm173_vm11 = vcmp.eq.s32.totalorder %v115_v44, %v2034_v51  ;;  %vm174_vm12 = vcmp.eq.s32.totalorder %v122_v45, %v2034_v51  ;;  %v2064_v58 = vadd.f32 %v240_v40, %v239_v33 }
  0xb3   :  { %v252_v54 = vrot.slane %v251_v46, 2  ;;  %v245_v55 = vrot.slane %v244_v47, 2  ;;  %v265_v56 = vadd.f32 %v264_v48, %v263_v42  ;;  %v258_v57 = vadd.f32 %v257_v49, %v256_v43 }
  0xb4   :  { %v372_v59 = vsel %vm371_vm7, %v227_v53, %v220_v52  ;;  %v1532_v60 = vsel %vm173_vm11, 1.0, %v1934_v1  ;;  %v1533_v61 = vsel %vm174_vm12, 1.0, %v1934_v1  ;;  %v129_v62 = vpop.permute.xlu0 %128  ;;  %v136_v63 = vpop.permute.xlu1 %135  ;;  %vm392_vm10 = vcmask 261120  }
  0xb5   :  { %v2070_v0 = vsel %vm373_vm8, %v234_v31, %v372_v59  ;;  %v253_v5 = vadd.f32 %v252_v54, %v251_v46  ;;  %v246_v7 = vadd.f32 %v245_v55, %v244_v47  ;;  %v266_v8 = vrot.slane %v265_v56, 2 }
  0xb6   :  { %v259_v9 = vrot.slane %v258_v57, 2  ;;  %v270_v10 = vsel %vm213_vm0, %v1532_v60, 0.0  ;;  %v277_v11 = vsel %vm213_vm0, %v1533_v61, 0.0  ;;  %vm175_vm13 = vcmp.eq.s32.totalorder %v129_v62, %v2034_v51 }
  0xb7   :  { %v254_v12 = vrot.slane %v253_v5, 1  ;;  %v247_v13 = vrot.slane %v246_v7, 1  ;;  %v267_v14 = vadd.f32 %v266_v8, %v265_v56  ;;  %v271_v15 = vrot.slane %v270_v10, 4 }
  0xb8   :  { %v260_v16 = vadd.f32 %v259_v9, %v258_v57  ;;  %v278_v17 = vrot.slane %v277_v11, 4  ;;  %v1534_v18 = vsel %vm175_vm13, 1.0, %v1934_v1  ;;  %vm176_vm14 = vcmp.eq.s32.totalorder %v136_v63, %v2034_v51  ;;  %v143_v19 = vpop.permute.xlu0 %142  ;;  %v150_v29 = vpop.permute.xlu1 %149 }
  0xb9   :  { %v2077_v20 = vadd.f32 %v254_v12, %v253_v5  ;;  %v2079_v21 = vadd.f32 %v247_v13, %v246_v7  ;;  %v268_v22 = vrot.slane %v267_v14, 1  ;;  %v272_v23 = vadd.f32 %v271_v15, %v270_v10 }
  0xba   :  { %v261_v24 = vrot.slane %v260_v16, 1  ;;  %v279_v25 = vadd.f32 %v278_v17, %v277_v11  ;;  %v284_v26 = vsel %vm213_vm0, %v1534_v18, 0.0  ;;  %v1535_v27 = vsel %vm176_vm14, 1.0, %v1934_v1 }
  0xbb   :  { %v2083_v30 = vadd.f32 %v268_v22, %v267_v14  ;;  %v273_v31 = vrot.slane %v272_v23, 2  ;;  %v285_v32 = vrot.slane %v284_v26, 4  ;;  %v291_v33 = vsel %vm213_vm0, %v1535_v27, 0.0 }
  0xbc   :  { %v2086_v34 = vadd.f32 %v261_v24, %v260_v16  ;;  %v280_v35 = vrot.slane %v279_v25, 2  ;;  %v292_v36 = vrot.slane %v291_v33, 4  ;;  %vm177_vm1 = vcmp.eq.s32.totalorder %v143_v19, %v2034_v51  ;;  %v157_v41 = vpop.permute.xlu0 %156  ;;  %v164_v55 = vpop.permute.xlu1 %163  ;;  %v556_v24 = vld [vmem:[#allocation5 + $0x38] sm:$0xff] }
  0xbd   :  { %v274_v37 = vadd.f32 %v273_v31, %v272_v23  ;;  %v286_v38 = vadd.f32 %v285_v32, %v284_v26  ;;  %v1536_v40 = vsel %vm177_vm1, 1.0, %v1934_v1  ;;  %vm178_vm3 = vcmp.eq.s32.totalorder %v150_v29, %v2034_v51 }
  0xbe   :  { %v281_v42 = vadd.f32 %v280_v35, %v279_v25  ;;  %v293_v43 = vadd.f32 %v292_v36, %v291_v33  ;;  %v298_v44 = vsel %vm213_vm0, %v1536_v40, 0.0  ;;  %v1537_v45 = vsel %vm178_vm3, 1.0, %v1934_v1  ;;  %v559_v25 = vld [vmem:[#allocation5 + $0x50] sm:$0xff] }
  0xbf   :  { %v275_v46 = vrot.slane %v274_v37, 1  ;;  %v287_v47 = vrot.slane %v286_v38, 2  ;;  %v299_v48 = vrot.slane %v298_v44, 4  ;;  %v305_v49 = vsel %vm213_vm0, %v1537_v45, 0.0  ;;  %v555_v40 = vld [vmem:[#allocation5 + $0x30] sm:$0xff]  ;;  %v565_v45 = vld [vmem:[#allocation5 + $0x80] sm:$0xff] }
  0xc0   :  { %v282_v52 = vrot.slane %v281_v42, 1  ;;  %v294_v53 = vrot.slane %v293_v43, 2  ;;  %v306_v54 = vrot.slane %v305_v49, 4  ;;  %vm179_vm9 = vcmp.eq.s32.totalorder %v157_v41, %v2034_v51  ;;  %v558_v41 = vld [vmem:[#allocation5 + $0x48] sm:$0xff] }
  0xc1   :  { %v276_v56 = vadd.f32 %v275_v46, %v274_v37  ;;  %v288_v57 = vadd.f32 %v287_v47, %v286_v38  ;;  %v300_v59 = vadd.f32 %v299_v48, %v298_v44  ;;  %v1538_v60 = vsel %vm179_vm9, 1.0, %v1934_v1  ;;  %v562_v44 = vld [vmem:[#allocation5 + $0x68] sm:$0xff]  ;;  %v561_v48 = vld [vmem:[#allocation5 + $0x60] sm:$0xff] }
  0xc2   :  { %v283_v61 = vadd.f32 %v282_v52, %v281_v42  ;;  %v295_v62 = vadd.f32 %v294_v53, %v293_v43  ;;  %v307_v63 = vadd.f32 %v306_v54, %v305_v49  ;;  %v312_v5 = vsel %vm213_vm0, %v1538_v60, 0.0  ;;  %v564_v52 = vld [vmem:[#allocation5 + $0x78] sm:$0xff]  ;;  %v551_v53 = vld [vmem:[#allocation5 + $0x10] sm:$0xff]  ;;  %v554_v54 = vld [vmem:[#allocation5 + $0x28] sm:$0xff] }
  0xc3   :  { %v289_v7 = vrot.slane %v288_v57, 1  ;;  %v301_v8 = vrot.slane %v300_v59, 2  ;;  %v313_v9 = vrot.slane %v312_v5, 4  ;;  %vm180_vm11 = vcmp.eq.s32.totalorder %v164_v55, %v2034_v51 }
  0xc4   :  { %v385_v10 = vsel %vm371_vm7, %v283_v61, %v276_v56  ;;  %v296_v11 = vrot.slane %v295_v62, 1  ;;  %v308_v12 = vrot.slane %v307_v63, 2  ;;  %v1539_v13 = vsel %vm180_vm11, 1.0, %v1934_v1  ;;  %v568_v56 = vld [vmem:[#allocation5 + $0x98] sm:$0xff] }
  0xc5   :  { %v290_v14 = vadd.f32 %v289_v7, %v288_v57  ;;  %v302_v15 = vadd.f32 %v301_v8, %v300_v59  ;;  %v314_v16 = vadd.f32 %v313_v9, %v312_v5  ;;  %v319_v17 = vsel %vm213_vm0, %v1539_v13, 0.0  ;;  %v571_v57 = vld [vmem:[#allocation5 + $0xb0] sm:$0xff]  ;;  %v570_v8 = vld [vmem:[#allocation5 + $0xa8] sm:$0xff]  ;;  %v557_v9 = vld [vmem:[#allocation5 + $0x40] sm:$0xff] }
  0xc6   :  { %v297_v18 = vadd.f32 %v296_v11, %v295_v62  ;;  %v309_v19 = vadd.f32 %v308_v12, %v307_v63  ;;  %v320_v22 = vrot.slane %v319_v17, 4  ;;  %v376_v23 = vsel %vm375_vm15, %v2064_v58, %v2070_v0  ;;  %v567_v63 = vld [vmem:[#allocation5 + $0x90] sm:$0xff]  ;;  %v574_v11 = vld [vmem:[#allocation5 + $0xc8] sm:$0xff]  ;;  %v577_v12 = vld [vmem:[#allocation5 + $0xe0] sm:$0xff] }
  0xc7   :  { %v386_v26 = vsel %vm373_vm8, %v290_v14, %v385_v10  ;;  %v303_v27 = vrot.slane %v302_v15, 1  ;;  %v315_v29 = vrot.slane %v314_v16, 2  ;;  %v378_v31 = vsel %vm377_vm2, %v2079_v21, %v376_v23  ;;  %v560_v10 = vld [vmem:[#allocation5 + $0x58] sm:$0xff] }
  0xc8   :  { %v387_v32 = vsel %vm375_vm15, %v297_v18, %v386_v26  ;;  %v310_v33 = vrot.slane %v309_v19, 1  ;;  %v321_v35 = vadd.f32 %v320_v22, %v319_v17  ;;  %v380_v36 = vsel %vm379_vm4, %v2077_v20, %v378_v31  ;;  %v576_v18 = vld [vmem:[#allocation5 + $0xd8] sm:$0xff]  ;;  %v566_v22 = vld [vmem:[#allocation5 + $0x88] sm:$0xff]  ;;  %v579_v26 = vld [vmem:[#allocation5 + $0xf0] sm:$0xff] }
  0xc9   :  { %v304_v37 = vadd.f32 %v303_v27, %v302_v15  ;;  %v316_v38 = vadd.f32 %v315_v29, %v314_v16  ;;  %v382_v58 = vsel %vm381_vm5, %v2086_v34, %v380_v36  ;;  %v2112_v0 = vpack.c.bf16 %v559_v25, %v556_v24  ;;  %v573_v15 = vld [vmem:[#allocation5 + $0xc0] sm:$0xff]  ;;  %v580_v23 = vld [vmem:[#allocation5 + $0xf8] sm:$0xff]  ;;  %v583_v24 = vld [vmem:[#allocation5 + $0x110] sm:$0xff] }
  0xca   :  { %v311_v42 = vadd.f32 %v310_v33, %v309_v19  ;;  %v322_v43 = vrot.slane %v321_v35, 2  ;;  %v384_v21 = vsel %vm383_vm6, %v2083_v30, %v382_v58  ;;  %v2120_v34 = vpack.c.bf16 %v558_v41, %v555_v40  ;;  %v563_v19 = vld [vmem:[#allocation5 + $0x70] sm:$0xff]  ;;  %v582_v31 = vld [vmem:[#allocation5 + $0x108] sm:$0xff]  ;;  %v572_v33 = vld [vmem:[#allocation5 + $0xb8] sm:$0xff] }
  0xcb   :  { %v317_v46 = vrot.slane %v316_v38, 1  ;;  %1540 = vmatmul.mubr.msk.f32.vlgmr.msra.gmra.mrb[0].mxu0 %vm392_vm10, %v384_v21  ;;  %1596 = vmatprep.mubr.msk.f32.mxu1 %vm392_vm10, %v384_v21  ;;  %v388_v20 = vsel %vm377_vm2, %v304_v37, %v387_v32  ;;  %v2124_v30 = vpack.c.bf16 %v565_v45, %v562_v44  ;;  %v2129_v62 = vpack.c.bf16 %v564_v52, %v561_v48  ;;  %v569_v32 = vld [vmem:[#allocation5 + $0xa0] sm:$0xff]  ;;  %v588_v41 = vld [vmem:[#allocation5 + $0x138] sm:$0xff]  ;;  %v595_v44 = vld [vmem:[#allocation5 + $0x170] sm:$0xff] }
  0xcc   :  { %v323_v47 = vadd.f32 %v322_v43, %v321_v35  ;;  %1688 = vmatpush1.bf16.msra.mxu0 %v2052_v28  ;;  %467 = vmatprep.mubr.f32.mxu0 %v1934_v1  ;;  %v389_v59 = vsel %vm379_vm4, %v311_v42, %v388_v20  ;;  %v2131_v5 = vpack.c.bf16 %v554_v54, %v551_v53  ;;  %vm1936_vm0 = vmmov 0   ;;  %v586_v35 = vld [vmem:[#allocation5 + $0x128] sm:$0xff]  ;;  %v589_v36 = vld [vmem:[#allocation5 + $0x140] sm:$0xff]  ;;  %v575_v42 = vld [vmem:[#allocation5 + $0xd0] sm:$0xff] }
  0xcd   :  { %v318_v49 = vadd.f32 %v317_v46, %v316_v38  ;;  %1690 = vmatprep.subr.bf16.mxu0 %v2112_v0  ;;  %v2134_v7 = vpack.c.bf16 %v571_v57, %v568_v56  ;;  %v2140_v14 = vpack.c.bf16 %v570_v8, %v567_v63  ;;  %v2143_v16 = vpack.c.bf16 %v560_v10, %v557_v9  ;;  %v585_v38 = vld [vmem:[#allocation5 + $0x120] sm:$0xff]  ;;  %v578_v43 = vld [vmem:[#allocation5 + $0xe8] sm:$0xff]  ;;  %v592_v21 = vld [vmem:[#allocation5 + $0x158] sm:$0xff] }
  0xce   :  { %v324_v55 = vrot.slane %v323_v47, 1  ;;  %v2146_v17 = vpack.c.bf16 %v577_v12, %v574_v11  ;;  %v2153_v25 = vpack.c.bf16 %v576_v18, %v573_v15  ;;  %v2156_v27 = vpack.c.bf16 %v566_v22, %v563_v19  ;;  %v591_v46 = vld [vmem:[#allocation5 + $0x150] sm:$0xff]  ;;  %v594_v48 = vld [vmem:[#allocation5 + $0x168] sm:$0xff]  ;;  %v584_v52 = vld [vmem:[#allocation5 + $0x118] sm:$0xff] }
  0xcf   :  { %v390_v60 = vsel %vm381_vm5, %v318_v49, %v389_v59  ;;  %v2159_v29 = vpack.c.bf16 %v583_v24, %v580_v23  ;;  %v2163_v37 = vpack.c.bf16 %v582_v31, %v579_v26  ;;  %v1727_v58 = vpack.c.bf16 %v572_v33, %v569_v32  ;;  %v581_v49 = vld [vmem:[#allocation5 + $0x100] sm:$0xff]  ;;  %v590_v56 = vld [vmem:[#allocation5 + $0x148] sm:$0xff] }
  0xd0   :  { %v325_v61 = vadd.f32 %v324_v55, %v323_v47  ;;  %1692 = vmatpush1.bf16.msra.mxu0 %v2120_v34  ;;  %v1709_v40 = vpack.c.bf16 %v589_v36, %v586_v35  ;;  %v1711_v45 = vpack.c.bf16 %v588_v41, %v585_v38  ;;  %v1730_v20 = vpack.c.bf16 %v578_v43, %v575_v42  ;;  %v587_v55 = vld [vmem:[#allocation5 + $0x130] sm:$0xff]  ;;  %v593_v59 = vld [vmem:[#allocation5 + $0x160] sm:$0xff] }
  0xd1   :  { %1694 = vmatprep.subr.bf16.mxu0 %v2124_v30  ;;  %v1713_v47 = vpack.c.bf16 %v595_v44, %v592_v21  ;;  %v1715_v53 = vpack.c.bf16 %v594_v48, %v591_v46  ;;  %v1733_v54 = vpack.c.bf16 %v584_v52, %v581_v49  ;;  %v1736_v57 = vpack.c.bf16 %v590_v56, %v587_v55 }
  0xd2   :  { %v391_v13 = vsel %vm383_vm6, %v325_v61, %v390_v60  ;;  %v596_v60 = vld [vmem:[#allocation5 + $0x178] sm:$0xff]  ;;  %vm652_vm12 = vcmp.lt.s32.totalorder %v2034_v51, 64  ;;  %vm987_vm14 = vcmask 130048   ;;  %vm1022_vm15 = vcmask 58368  }
  0xd3   :  { %1541 = vmatmul.mubr.msk.f32.gmra.mrb[2].mxu0 %vm392_vm10, %v391_v13  ;;  %1597 = vmatmul.mubr.msk.f32.vlgmr.msra.gmra.mrb[0].mxu1 %vm392_vm10, %v391_v13  ;;  %v1739_v61 = vpack.c.bf16 %v596_v60, %v593_v59  ;;  %vm1091_vm1 = vcmask 261248   ;;  %vm1110_vm2 = vcmask 786048   ;;  %vm1241_vm3 = vcmask 392448  }
  0xd4   :  { %1696 = vmatpush1.bf16.msra.mxu0 %v2129_v62  ;;  %1719 = vmatpush3.bf16.msra.mxu1 %v2131_v5  ;;  %vm1268_vm4 = vcmask 917248   ;;  %vm1439_vm5 = vcmask 523648   ;;  %vm1466_vm6 = vcmask 1048448   ;;  %vm1506_vm9 = vcmask 254976  }
  0xd5   :  { %1698 = vmatprep.subr.bf16.mxu0 %v2134_v7  ;;  %722 = vmatprep.mubr.f32.mxu0 %v1934_v1 }
  0xd6   :  { %1720 = vmatprep.subr.bf16.mxu1 %v1935_v50  ;;  %1631 = vmatprep.mubr.msk.f32.mxu1 %vm1936_vm0, %v1934_v1 }
  0xd8   :  { %1700 = vmatpush1.bf16.msra.mxu0 %v2140_v14  ;;  %1722 = vmatpush3.bf16.msra.mxu1 %v2143_v16 }
  0xd9   :  { %1702 = vmatprep.subr.bf16.mxu0 %v2146_v17  ;;  %1723 = vmatprep.subr.bf16.mxu1 %v1935_v50 }
  0xdc   :  { %1704 = vmatpush1.bf16.msra.mxu0 %v2153_v25  ;;  %1725 = vmatpush3.bf16.msra.mxu1 %v2156_v27 }
  0xdd   :  { %1706 = vmatprep.subr.bf16.mxu0 %v2159_v29  ;;  %1726 = vmatprep.subr.bf16.mxu1 %v1935_v50 }
  0xe0   :  { %1708 = vmatpush1.bf16.msra.mxu0 %v2163_v37  ;;  %1728 = vmatpush3.bf16.msra.mxu1 %v1727_v58 }
  0xe1   :  { %1710 = vmatprep.subr.bf16.mxu0 %v1709_v40  ;;  %1729 = vmatprep.subr.bf16.mxu1 %v1935_v50 }
  0xe4   :  { %1712 = vmatpush1.bf16.msra.mxu0 %v1711_v45  ;;  %1731 = vmatpush3.bf16.msra.mxu1 %v1730_v20 }
  0xe5   :  { %1714 = vmatprep.subr.bf16.mxu0 %v1713_v47  ;;  %1732 = vmatprep.subr.bf16.mxu1 %v1935_v50 }
  0xe8   :  { %1716 = vmatpush1.bf16.msra.mxu0 %v1715_v53  ;;  %1734 = vmatpush3.bf16.msra.mxu1 %v1733_v54 }
  0xe9   :  { %1735 = vmatprep.subr.bf16.mxu1 %v1935_v50  ;;  %1742 = vmatprep.subr.bf16.mxu0 %v2029_v39  ;;  %v615_v39 = vadd.s32 256, %v2034_v51 }
  0xeb   :  { %723 = vmatmul.mubr.f32.vlgmr.msra.gmra.mrb[4].mxu0 %v1934_v1 }
  0xec   :  { %1737 = vmatpush3.bf16.msra.mxu1 %v1736_v57  ;;  %1744 = vmatpush1.bf16.msra.mxu0 %v2052_v28 }
  0xed   :  { %1738 = vmatprep.subr.bf16.mxu1 %v1935_v50  ;;  %1746 = vmatprep.subr.bf16.mxu0 %v2112_v0  ;;  %v614_v0 = vadd.s32 128, %v2034_v51 }
  0xee   :  { %887 = vmatprep.mubr.f32.mxu0 %v1934_v1 }
  0xf0   :  { %1740 = vmatpush3.bf16.msra.mxu1 %v1739_v61  ;;  %1748 = vmatpush1.bf16.msra.mxu0 %v2120_v34  ;;  %v338_v34 = vld [vmem:[%s2390_s2] sm:$0x7] }
  0xf1   :  { %1773 = vmatprep.subr.bf16.mxu1 %v1935_v50  ;;  %1750 = vmatprep.subr.bf16.mxu0 %v2124_v30  ;;  %v634_v30 = vand.u32 127, %v615_v39  ;;  %v351_v63 = vrot.slane %v338_v34, %v2007_v4 }
  0xf3   :  { %1632 = vmatmul.mubr.f32.vlgmr.msra.gmra.mrb[2].mxu1 %v1934_v1  ;;  %vm2209_vm8 = vcmp.lt.s32.totalorder %v634_v30, 64 }
  0xf4   :  { %1775 = vmatpush3.bf16.msra.mxu1 %v2131_v5  ;;  %1752 = vmatpush1.bf16.msra.mxu0 %v2129_v62  ;;  %v343_v62 = vrot.slane %v338_v34, %v2004_v3  ;;  %v627_v5 = vand.u32 127, %v614_v0 }
  0xf5   :  { %1776 = vmatprep.subr.bf16.mxu1 %v1935_v50  ;;  %1754 = vmatprep.subr.bf16.mxu0 %v2134_v7  ;;  %v347_v7 = vrot.slane %v338_v34, %v2011_v6 }
  0xf6   :  { %1666 = vmatprep.mubr.msk.f32.mxu1 %vm1936_vm0, %v1934_v1  ;;  %vm2216_vm13 = vcmp.lt.s32.totalorder %v627_v5, 64 }
  0xf8   :  { %1778 = vmatpush3.bf16.msra.mxu1 %v2143_v16  ;;  %1756 = vmatpush1.bf16.msra.mxu0 %v2140_v14 }
  0xf9   :  { %1779 = vmatprep.subr.bf16.mxu1 %v1935_v50  ;;  %1758 = vmatprep.subr.bf16.mxu0 %v2146_v17 }
  0xfc   :  { %1781 = vmatpush3.bf16.msra.mxu1 %v2156_v27  ;;  %1760 = vmatpush1.bf16.msra.mxu0 %v2153_v25  ;;  %v597_v27 = vld [vmem:[%s2392_s4] sm:$0x7]  ;;  %s1937_s4 = smov 64  }
  0xfd   :  { %1782 = vmatprep.subr.bf16.mxu1 %v1935_v50  ;;  %1762 = vmatprep.subr.bf16.mxu0 %v2159_v29  ;;  %v602_v29 = vrot.slane %v597_v27, %v2004_v3  ;;  %v606_v31 = vrot.slane %v597_v27, %v2011_v6  ;;  %v610_v44 = vrot.slane %v597_v27, %v2007_v4 }
 0x100   :  { %1784 = vmatpush3.bf16.msra.mxu1 %v1727_v58  ;;  %1764 = vmatpush1.bf16.msra.mxu0 %v2163_v37 }
 0x101   :  { %1785 = vmatprep.subr.bf16.mxu1 %v1935_v50  ;;  %1766 = vmatprep.subr.bf16.mxu0 %v1709_v40 }
 0x104   :  { %1787 = vmatpush3.bf16.msra.mxu1 %v1730_v20  ;;  %1768 = vmatpush1.bf16.msra.mxu0 %v1711_v45 }
 0x105   :  { %1788 = vmatprep.subr.bf16.mxu1 %v1935_v50  ;;  %1770 = vmatprep.subr.bf16.mxu0 %v1713_v47 }
 0x108   :  { %1790 = vmatpush3.bf16.msra.mxu1 %v1733_v54  ;;  %1772 = vmatpush1.bf16.msra.mxu0 %v1715_v53 }
 0x109   :  { %1791 = vmatprep.subr.bf16.mxu1 %v1935_v50 }
 0x10c   :  { %1793 = vmatpush3.bf16.msra.mxu1 %v1736_v57 }
 0x10d   :  { %1794 = vmatprep.subr.bf16.mxu1 %v1935_v50 }
 0x110   :  { %1796 = vmatpush3.bf16.msra.mxu1 %v1739_v61 }
 0x19e   :  { %v463_v1 = vpop.f32.mrb[0].mxu0 }
 0x19f   :  { %v465_v28 = vpop.f32.mrb[1].mxu0  ;;  %v464_v10 = vadd.f32 %v463_v1, %v343_v62 }
 0x1a0   :  { %v466_v16 = vadd.f32 %v465_v28, %v347_v7 }
 0x1a6   :  { %v469_v50 = vpop.f32.mrb[2].mxu0  ;;  %v1598_v8 = vpop.f32.mrb[0].mxu1 }
 0x1a7   :  { %v470_v11 = vadd.f32 %v469_v50, %v343_v62  ;;  %v2214_v12 = vadd.f32 %v1598_v8, %v351_v63  ;;  %v471_v13 = vpop.f32.mrb[3].mxu0  ;;  %v540_v14 = vpop.f32.mrb[1].mxu1 }
 0x1a8   :  { %v472_v17 = vadd.f32 %v471_v13, %v347_v7  ;;  %v2220_v18 = vadd.f32 %v540_v14, %v351_v63 }
 0x1a9   :  { %v655_v19 = vsel %vm652_vm12, %v464_v10, %v470_v11  ;;  %v820_v22 = vsel %vm652_vm12, %v470_v11, %v464_v10 }
 0x1aa   :  { %v657_v23 = vsel %vm2209_vm8, %v2220_v18, %v2214_v12  ;;  %v822_v24 = vsel %vm2209_vm8, %v2214_v12, %v2220_v18  ;;  %v656_v25 = vsel %vm2216_vm13, %v466_v16, %v472_v17  ;;  %v821_v26 = vsel %vm2216_vm13, %v472_v17, %v466_v16 }
 0x1be   :  { %v724_v32 = vpop.f32.mrb[4].mxu0 }
 0x1bf   :  { %v725_v33 = vadd.f32 %v724_v32, %v602_v29  ;;  %v726_v35 = vpop.f32.mrb[5].mxu0 }
 0x1c0   :  { %v727_v36 = vadd.f32 %v726_v35, %v606_v31 }
 0x1c1   :  { %v799_v37 = vadd.f32 %v725_v33, %v655_v19 }
 0x1c2   :  { %v806_v38 = vadd.f32 %v727_v36, %v656_v25 }
 0x1c3   :  { %v1544_v58 = vmul.f32 -1.442695, %v799_v37 }
 0x1c4   :  { %v1545_v42 = vmul.f32 -1.442695, %v806_v38 }
 0x1c5   :  { %1814 = vpow2.f32 %v1544_v58 }
 0x1c6   :  { %v795_v40 = vpop.f32.mrb[2].mxu1  ;;  %1816 = vpow2.f32 %v1545_v42 }
 0x1c7   :  { %v1633_v41 = vpop.f32.mrb[3].mxu1  ;;  %v796_v20 = vadd.f32 %v795_v40, %v610_v44 }
 0x1c8   :  { %v1938_v41 = vmov 0  }
 0x1c9   :  { %1813 = vset.pattern.permute.xlu1 %v1938_v41  ;;  %1812 = vset.pattern.permute.xlu0 %v1938_v41 }
 0x1cf   :  { %v1815_v43 = vpop.eup %1814 }
 0x1d0   :  { %v803_v21 = vadd.f32 1.0, %v1815_v43  ;;  %v1817_v45 = vpop.eup %1816 }
 0x1d1   :  { %v810_v46 = vadd.f32 1.0, %v1817_v45 }
 0x1d2   :  { %1818 = vrcp.f32 %v803_v21 }
 0x1d3   :  { %1820 = vrcp.f32 %v810_v46 }
 0x1dc   :  { %v1819_v47 = vpop.eup %1818 }
 0x1dd   :  { %v813_v48 = vmul.f32 %v1819_v47, %v796_v20  ;;  %v1821_v52 = vpop.eup %1820 }
 0x1de   :  { %v816_v53 = vsub.f32 1.0, %v1821_v52  ;;  %v818_v55 = vmul.f32 0.0, %v1821_v52 }
 0x1df   :  { %v814_v49 = vadd.f32 %v813_v48, %v657_v23 }
 0x1e1   :  { %1822 = vtanh.f32 %v814_v49 }
 0x1eb   :  { %v1823_v54 = vpop.eup %1822 }
 0x1ec   :  { %v817_v56 = vmul.f32 %v1823_v54, %v816_v53 }
 0x1ee   :  { %v2240_v57 = vadd.f32 %v818_v55, %v817_v56 }
 0x1f0   :  { %888 = vmatmul.mubr.f32.vlgmr.msra.gmra.mrb[6].mxu0 %v2240_v57  ;;  %1667 = vmatmul.mubr.f32.vlgmr.msra.gmra.mrb[4].mxu1 %v2240_v57  ;;  %v985_v4 = vmul.f32 0.0, %v2240_v57 }
 0x1f2   :  { %998 = vrot.lane.b32.xlu1 %v985_v4, %s1937_s4 }
 0x264   :  { %v999_v25 = vpop.permute.xlu1 %998 }
 0x2c3   :  { %v889_v59 = vpop.f32.mrb[6].mxu0  ;;  %v960_v60 = vpop.f32.mrb[4].mxu1 }
 0x2c4   :  { %v890_v61 = vadd.f32 %v889_v59, %v602_v29  ;;  %v891_v1 = vpop.f32.mrb[7].mxu0  ;;  %v1668_v39 = vpop.f32.mrb[5].mxu1  ;;  %v961_v8 = vadd.f32 %v960_v60, %v610_v44 }
 0x2c5   :  { %v892_v28 = vadd.f32 %v891_v1, %v606_v31  ;;  %v2257_v31 = vsub.s32 %v2034_v51, %v2001_v2 }
 0x2c6   :  { %v964_v0 = vadd.f32 %v890_v61, %v820_v22  ;;  %v988_v22 = vsel %vm987_vm14, %v985_v4, 0.0 }
 0x2c7   :  { %v971_v34 = vadd.f32 %v892_v28, %v821_v26  ;;  %v1005_v26 = vsel %vm987_vm14, %v999_v25, 0.0 }
 0x2c8   :  { %v1546_v30 = vmul.f32 -1.442695, %v964_v0 }
 0x2c9   :  { %v1547_v62 = vmul.f32 -1.442695, %v971_v34 }
 0x2ca   :  { %1824 = vpow2.f32 %v1546_v30 }
 0x2cb   :  { %1826 = vpow2.f32 %v1547_v62 }
 0x2d4   :  { %v1825_v63 = vpop.eup %1824 }
 0x2d5   :  { %v968_v5 = vadd.f32 1.0, %v1825_v63  ;;  %v1827_v7 = vpop.eup %1826 }
 0x2d6   :  { %v975_v50 = vadd.f32 1.0, %v1827_v7 }
 0x2d7   :  { %1828 = vrcp.f32 %v968_v5 }
 0x2d8   :  { %1830 = vrcp.f32 %v975_v50 }
 0x2e1   :  { %v1829_v9 = vpop.eup %1828 }
 0x2e2   :  { %v978_v10 = vmul.f32 %v1829_v9, %v961_v8  ;;  %v1831_v12 = vpop.eup %1830 }
 0x2e3   :  { %v981_v13 = vsub.f32 1.0, %v1831_v12  ;;  %v983_v16 = vmul.f32 %v1831_v12, %v2240_v57 }
 0x2e4   :  { %v979_v11 = vadd.f32 %v978_v10, %v822_v24 }
 0x2e6   :  { %1832 = vtanh.f32 %v979_v11 }
 0x2f0   :  { %v1833_v14 = vpop.eup %1832 }
 0x2f1   :  { %v982_v15 = vmul.f32 %v1833_v14, %v981_v13 }
 0x2f3   :  { %v2247_v17 = vadd.f32 %v983_v16, %v982_v15 }
 0x2f5   :  { %v986_v18 = vmul.f32 0.0, %v2247_v17 }
 0x2f7   :  { %996 = vrot.lane.b32.xlu0 %v986_v18, %s1937_s4  ;;  %v991_v19 = vsel %vm987_vm14, %v986_v18, 0.0 }
 0x2f8   :  { %992 = vadd.xlane.f32.xlu1 %v991_v19 }
 0x316   :  { %989 = vadd.xlane.f32.xlu0 %v988_v22 }
 0x369   :  { %v997_v23 = vpop.permute.xlu0 %996 }
 0x36a   :  { %v1002_v24 = vsel %vm987_vm14, %v997_v23, 0.0 }
 0x36b   :  { %1003 = vadd.xlane.f32.xlu0 %v1002_v24 }
 0x36f   :  { %1006 = vadd.xlane.f32.xlu0 %v1005_v26 }
 0x385   :  { %v993_v33 = vpop.xlane.xlu1 %992 }
 0x3a3   :  { %v990_v27 = vpop.xlane.xlu0 %989 }
 0x3f8   :  { %v1004_v29 = vpop.xlane.xlu0 %1003 }
 0x3f9   :  { %v1008_v32 = vadd.f32 %v1004_v29, %v990_v27 }
 0x3fb   :  { %v1015_v37 = vrot.slane %v1008_v32, %v2257_v31 }
 0x3fc   :  { %v1007_v35 = vpop.xlane.xlu0 %1006 }
 0x3fd   :  { %v1009_v36 = vadd.f32 %v1007_v35, %v993_v33 }
 0x3ff   :  { %v1019_v38 = vrot.slane %v1009_v36, %v2257_v31 }
 0x401   :  { %v1020_v58 = vsel %vm371_vm7, %v1019_v38, %v1015_v37 }
 0x402   :  { %v1023_v40 = vsel %vm1022_vm15, %v1020_v58, -inf }
 0x403   :  { %1024 = vmax.xlane.f32.xlu1 %v1023_v40 }
 0x490   :  { %v1025_v42 = vpop.xlane.xlu1 %1024 }
 0x491   :  { %v1030_v2 = vrot.slane %v1025_v42, %v2004_v3  ;;  %v1034_v51 = vrot.slane %v1025_v42, %v2011_v6 }
 0x493   :  { %v1037_v43 = vsub.f32 %v1008_v32, %v1030_v2  ;;  %v1038_v21 = vsub.f32 %v1009_v36, %v1034_v51 }
 0x495   :  { %v1039_v44 = vmul.f32 1.442695, %v1037_v43  ;;  %v1041_v45 = vmul.f32 1.442695, %v1038_v21 }
 0x497   :  { %1834 = vpow2.f32 %v1039_v44 }
 0x498   :  { %1836 = vpow2.f32 %v1041_v45 }
 0x4a1   :  { %v1835_v46 = vpop.eup %1834 }
 0x4a2   :  { %v1837_v20 = vpop.eup %1836  ;;  %1046 = vperm.xlu0 %1812, %v1835_v46  }
 0x4a3   :  { %1049 = vperm.xlu1 %1813, %v1837_v20  }
 0x521   :  { %v1047_v47 = vpop.permute.xlu0 %1046 }
 0x522   :  { %v1050_v48 = vpop.permute.xlu1 %1049  ;;  %v1054_v49 = vrot.slane %v1047_v47, %v2257_v31 }
 0x523   :  { %v1058_v52 = vrot.slane %v1050_v48, %v2257_v31 }
 0x525   :  { %v1059_v53 = vsel %vm371_vm7, %v1058_v52, %v1054_v49 }
 0x526   :  { %v1061_v54 = vsel %vm1022_vm15, %v1059_v53, 0.0 }
 0x527   :  { %1062 = vadd.xlane.f32.xlu1 %v1061_v54 }
 0x5b4   :  { %v1063_v55 = vpop.xlane.xlu1 %1062 }
 0x5b5   :  { %v1068_v56 = vrot.slane %v1063_v55, %v2004_v3  ;;  %v1072_v4 = vrot.slane %v1063_v55, %v2011_v6 }
 0x5b7   :  { %1838 = vrcp.f32 %v1068_v56 }
 0x5b8   :  { %1840 = vrcp.f32 %v1072_v4 }
 0x5c1   :  { %v1839_v59 = vpop.eup %1838 }
 0x5c2   :  { %v1076_v60 = vmul.f32 %v1839_v59, %v1835_v46  ;;  %v1841_v61 = vpop.eup %1840 }
 0x5c3   :  { %v1078_v1 = vmul.f32 %v1841_v61, %v1837_v20 }
 0x5c4   :  { %1081 = vperm.xlu0 %1812, %v1076_v60  }
 0x5c8   :  { %1086 = vperm.xlu0 %1812, %v1078_v1  }
 0x643   :  { %v1082_v39 = vpop.permute.xlu0 %1081 }
 0x644   :  { %v1089_v28 = vmul.f32 %v1082_v39, %v2240_v57  ;;  %v1108_v0 = vmul.f32 %v1082_v39, %v2247_v17 }
 0x646   :  { %v1092_v34 = vsel %vm1091_vm1, %v1089_v28, 0.0  ;;  %v1111_v30 = vsel %vm1110_vm2, %v1108_v0, 0.0 }
 0x647   :  { %v1093_v62 = vrot.slane %v1092_v34, 4  ;;  %v1112_v63 = vrot.slane %v1111_v30, 4  ;;  %v1087_v5 = vpop.permute.xlu0 %1086 }
 0x648   :  { %v1090_v7 = vmul.f32 %v1087_v5, %v2247_v17  ;;  %v1109_v50 = vmul.f32 %v1087_v5, %v2240_v57 }
 0x649   :  { %v1094_v8 = vadd.f32 %v1093_v62, %v1092_v34  ;;  %v1113_v9 = vadd.f32 %v1112_v63, %v1111_v30 }
 0x64a   :  { %v1099_v10 = vsel %vm1091_vm1, %v1090_v7, 0.0  ;;  %v1118_v11 = vsel %vm1110_vm2, %v1109_v50, 0.0 }
 0x64b   :  { %v1095_v12 = vrot.slane %v1094_v8, 2  ;;  %v1114_v13 = vrot.slane %v1113_v9, 2  ;;  %v1100_v14 = vrot.slane %v1099_v10, 4  ;;  %v1119_v15 = vrot.slane %v1118_v11, 4 }
 0x64d   :  { %v1096_v16 = vadd.f32 %v1095_v12, %v1094_v8  ;;  %v1115_v18 = vadd.f32 %v1114_v13, %v1113_v9  ;;  %v1101_v19 = vadd.f32 %v1100_v14, %v1099_v10  ;;  %v1120_v22 = vadd.f32 %v1119_v15, %v1118_v11 }
 0x64f   :  { %v1102_v23 = vrot.slane %v1101_v19, 2  ;;  %v1121_v24 = vrot.slane %v1120_v22, 2  ;;  %v1097_v25 = vrot.slane %v1096_v16, 1  ;;  %v1116_v26 = vrot.slane %v1115_v18, 1 }
 0x651   :  { %v1103_v27 = vadd.f32 %v1102_v23, %v1101_v19  ;;  %v1122_v29 = vadd.f32 %v1121_v24, %v1120_v22  ;;  %v2275_v32 = vadd.f32 %v1097_v25, %v1096_v16  ;;  %v2279_v35 = vadd.f32 %v1116_v26, %v1115_v18 }
 0x653   :  { %v1127_v33 = vmul.f32 %v2275_v32, %v2240_v57  ;;  %v1104_v36 = vrot.slane %v1103_v27, 1  ;;  %v1123_v37 = vrot.slane %v1122_v29, 1  ;;  %v1143_v58 = vmul.f32 %v2279_v35, %v2247_v17 }
 0x655   :  { %1131 = vrot.lane.b32.xlu0 %v1127_v33, %s1939_s23  ;;  %v2282_v38 = vadd.f32 %v1104_v36, %v1103_v27  ;;  %v2288_v41 = vadd.f32 %v1123_v37, %v1122_v29 }
 0x657   :  { %v1128_v40 = vmul.f32 %v2282_v38, %v2247_v17  ;;  %v1144_v42 = vmul.f32 %v2288_v41, %v2240_v57 }
 0x659   :  { %1147 = vrot.lane.b32.xlu0 %v1143_v58, %s1940_s24  ;;  %1133 = vrot.lane.b32.xlu1 %v1128_v40, %s1939_s23 }
 0x65d   :  { %1149 = vrot.lane.b32.xlu0 %v1144_v42, %s1940_s24 }
 0x6c7   :  { %v1132_v2 = vpop.permute.xlu0 %1131 }
 0x6c8   :  { %v1137_v51 = vsel %vm987_vm14, %v1132_v2, 0.0 }
 0x6c9   :  { %1138 = vadd.xlane.f32.xlu0 %v1137_v51 }
 0x6cb   :  { %v1134_v43 = vpop.permute.xlu1 %1133  ;;  %v1148_v21 = vpop.permute.xlu0 %1147 }
 0x6cc   :  { %v1140_v44 = vsel %vm987_vm14, %v1134_v43, 0.0  ;;  %v1153_v45 = vsel %vm987_vm14, %v1148_v21, 0.0 }
 0x6cd   :  { %1141 = vadd.xlane.f32.xlu1 %v1140_v44  ;;  %1154 = vadd.xlane.f32.xlu0 %v1153_v45 }
 0x6cf   :  { %v1150_v46 = vpop.permute.xlu0 %1149 }
 0x6d0   :  { %v1156_v20 = vsel %vm987_vm14, %v1150_v46, 0.0 }
 0x6d1   :  { %1157 = vadd.xlane.f32.xlu0 %v1156_v20 }
 0x756   :  { %v1139_v47 = vpop.xlane.xlu0 %1138 }
 0x75a   :  { %v1155_v48 = vpop.xlane.xlu0 %1154  ;;  %v1142_v52 = vpop.xlane.xlu1 %1141 }
 0x75b   :  { %v1159_v49 = vadd.f32 %v1155_v48, %v1139_v47 }
 0x75d   :  { %v1166_v55 = vrot.slane %v1159_v49, %v2257_v31 }
 0x75e   :  { %v1158_v53 = vpop.xlane.xlu0 %1157 }
 0x75f   :  { %v1160_v54 = vadd.f32 %v1158_v53, %v1142_v52 }
 0x761   :  { %v1170_v56 = vrot.slane %v1160_v54, %v2257_v31 }
 0x763   :  { %v1171_v4 = vsel %vm371_vm7, %v1170_v56, %v1166_v55 }
 0x764   :  { %v1173_v59 = vsel %vm1022_vm15, %v1171_v4, -inf }
 0x765   :  { %1174 = vmax.xlane.f32.xlu0 %v1173_v59 }
 0x7f2   :  { %v1175_v60 = vpop.xlane.xlu0 %1174 }
 0x7f3   :  { %v1180_v61 = vrot.slane %v1175_v60, %v2004_v3  ;;  %v1184_v1 = vrot.slane %v1175_v60, %v2011_v6 }
 0x7f5   :  { %v1187_v39 = vsub.f32 %v1159_v49, %v1180_v61  ;;  %v1188_v28 = vsub.f32 %v1160_v54, %v1184_v1 }
 0x7f7   :  { %v1189_v0 = vmul.f32 1.442695, %v1187_v39  ;;  %v1191_v34 = vmul.f32 1.442695, %v1188_v28 }
 0x7f9   :  { %1842 = vpow2.f32 %v1189_v0 }
 0x7fa   :  { %1844 = vpow2.f32 %v1191_v34 }
 0x803   :  { %v1843_v30 = vpop.eup %1842 }
 0x804   :  { %v1845_v62 = vpop.eup %1844  ;;  %1196 = vperm.xlu0 %1812, %v1843_v30  }
 0x805   :  { %1199 = vperm.xlu1 %1813, %v1845_v62  }
 0x883   :  { %v1197_v63 = vpop.permute.xlu0 %1196 }
 0x884   :  { %v1200_v5 = vpop.permute.xlu1 %1199  ;;  %v1204_v7 = vrot.slane %v1197_v63, %v2257_v31 }
 0x885   :  { %v1208_v50 = vrot.slane %v1200_v5, %v2257_v31 }
 0x887   :  { %v1209_v8 = vsel %vm371_vm7, %v1208_v50, %v1204_v7 }
 0x888   :  { %v1211_v9 = vsel %vm1022_vm15, %v1209_v8, 0.0 }
 0x889   :  { %1212 = vadd.xlane.f32.xlu1 %v1211_v9 }
 0x916   :  { %v1213_v10 = vpop.xlane.xlu1 %1212 }
 0x917   :  { %v1218_v11 = vrot.slane %v1213_v10, %v2004_v3  ;;  %v1222_v12 = vrot.slane %v1213_v10, %v2011_v6 }
 0x919   :  { %1846 = vrcp.f32 %v1218_v11 }
 0x91a   :  { %1848 = vrcp.f32 %v1222_v12 }
 0x923   :  { %v1847_v13 = vpop.eup %1846 }
 0x924   :  { %v1226_v14 = vmul.f32 %v1847_v13, %v1843_v30  ;;  %v1849_v15 = vpop.eup %1848 }
 0x925   :  { %v1228_v16 = vmul.f32 %v1849_v15, %v1845_v62 }
 0x926   :  { %1231 = vperm.xlu0 %1812, %v1226_v14  }
 0x92a   :  { %1236 = vperm.xlu0 %1812, %v1228_v16  }
 0x9a5   :  { %v1232_v18 = vpop.permute.xlu0 %1231 }
 0x9a6   :  { %v1239_v19 = vmul.f32 %v1232_v18, %v2240_v57  ;;  %v1266_v22 = vmul.f32 %v1232_v18, %v2247_v17 }
 0x9a8   :  { %v1242_v23 = vsel %vm1241_vm3, %v1239_v19, 0.0  ;;  %v1269_v24 = vsel %vm1268_vm4, %v1266_v22, 0.0 }
 0x9a9   :  { %v1243_v25 = vrot.slane %v1242_v23, 4  ;;  %v1270_v26 = vrot.slane %v1269_v24, 4  ;;  %v1237_v27 = vpop.permute.xlu0 %1236 }
 0x9aa   :  { %v1240_v29 = vmul.f32 %v1237_v27, %v2247_v17  ;;  %v1267_v33 = vmul.f32 %v1237_v27, %v2240_v57 }
 0x9ab   :  { %v1244_v36 = vadd.f32 %v1243_v25, %v1242_v23  ;;  %v1271_v37 = vadd.f32 %v1270_v26, %v1269_v24 }
 0x9ac   :  { %v1249_v58 = vsel %vm1241_vm3, %v1240_v29, 0.0  ;;  %v1276_v40 = vsel %vm1268_vm4, %v1267_v33, 0.0 }
 0x9ad   :  { %v1245_v42 = vrot.slane %v1244_v36, 2  ;;  %v1250_v2 = vrot.slane %v1249_v58, 4  ;;  %v1277_v51 = vrot.slane %v1276_v40, 4  ;;  %v1272_v43 = vrot.slane %v1271_v37, 2 }
 0x9af   :  { %v1251_v21 = vadd.f32 %v1250_v2, %v1249_v58  ;;  %v1278_v44 = vadd.f32 %v1277_v51, %v1276_v40  ;;  %v1246_v45 = vadd.f32 %v1245_v42, %v1244_v36  ;;  %v1273_v52 = vadd.f32 %v1272_v43, %v1271_v37 }
 0x9b1   :  { %v1252_v46 = vrot.slane %v1251_v21, 2  ;;  %v1247_v20 = vrot.slane %v1246_v45, 1  ;;  %v1279_v47 = vrot.slane %v1278_v44, 2  ;;  %v1274_v55 = vrot.slane %v1273_v52, 1 }
 0x9b3   :  { %v1248_v48 = vadd.f32 %v1247_v20, %v1246_v45  ;;  %v1253_v49 = vadd.f32 %v1252_v46, %v1251_v21  ;;  %v1280_v56 = vadd.f32 %v1279_v47, %v1278_v44  ;;  %v1275_v4 = vadd.f32 %v1274_v55, %v1273_v52 }
 0x9b5   :  { %1258 = vrot.lane.b32.xlu0 %v1248_v48, %s1939_s23  ;;  %v1254_v53 = vrot.slane %v1253_v49, 1  ;;  %v1281_v59 = vrot.slane %v1280_v56, 1 }
 0x9b7   :  { %v1255_v54 = vadd.f32 %v1254_v53, %v1253_v49  ;;  %v1282_v60 = vadd.f32 %v1281_v59, %v1280_v56 }
 0x9b9   :  { %1260 = vrot.lane.b32.xlu0 %v1255_v54, %s1939_s23 }
 0x9bd   :  { %1285 = vrot.lane.b32.xlu0 %v1275_v4, %s1939_s23 }
 0x9c1   :  { %1287 = vrot.lane.b32.xlu0 %v1282_v60, %s1939_s23 }
 0xa27   :  { %v1259_v61 = vpop.permute.xlu0 %1258 }
 0xa28   :  { %v2318_v1 = vadd.f32 %v1259_v61, %v2275_v32 }
 0xa2a   :  { %v1296_v39 = vrot.slane %v2318_v1, %v2004_v3 }
 0xa2b   :  { %v1261_v28 = vpop.permute.xlu0 %1260 }
 0xa2c   :  { %v2323_v0 = vadd.f32 %v1261_v28, %v2282_v38  ;;  %1303 = vrot.lane.b32.xlu0 %v1296_v39, %s1941_s25 }
 0xa2e   :  { %v1300_v34 = vrot.slane %v2323_v0, %v2004_v3 }
 0xa2f   :  { %v1286_v30 = vpop.permute.xlu0 %1285 }
 0xa30   :  { %v2328_v62 = vadd.f32 %v1286_v30, %v2279_v35  ;;  %1305 = vrot.lane.b32.xlu0 %v1300_v34, %s1941_s25 }
 0xa32   :  { %v1328_v32 = vrot.slane %v2328_v62, %v2004_v3 }
 0xa33   :  { %v1288_v63 = vpop.permute.xlu0 %1287 }
 0xa34   :  { %v2333_v5 = vadd.f32 %v1288_v63, %v2288_v41  ;;  %1335 = vrot.lane.b32.xlu1 %v1328_v32, %s1941_s25 }
 0xa36   :  { %v1332_v38 = vrot.slane %v2333_v5, %v2004_v3 }
 0xa38   :  { %1337 = vrot.lane.b32.xlu0 %v1332_v38, %s1941_s25 }
 0xa9e   :  { %v1304_v7 = vpop.permute.xlu0 %1303 }
 0xa9f   :  { %v1309_v50 = vmul.f32 %v1304_v7, %v2240_v57 }
 0xaa1   :  { %1313 = vrot.lane.b32.xlu0 %v1309_v50, %s1942_s26 }
 0xaa2   :  { %v1306_v35 = vpop.permute.xlu0 %1305 }
 0xaa3   :  { %v1310_v8 = vmul.f32 %v1306_v35, %v2247_v17 }
 0xaa5   :  { %1315 = vrot.lane.b32.xlu0 %v1310_v8, %s1942_s26 }
 0xaa6   :  { %v1336_v9 = vpop.permute.xlu1 %1335 }
 0xaa7   :  { %v1341_v41 = vmul.f32 %v1336_v9, %v2247_v17 }
 0xaa9   :  { %1345 = vrot.lane.b32.xlu0 %v1341_v41, %s1943_s27 }
 0xaaa   :  { %v1338_v10 = vpop.permute.xlu0 %1337 }
 0xaab   :  { %v1342_v11 = vmul.f32 %v1338_v10, %v2240_v57 }
 0xaad   :  { %1347 = vrot.lane.b32.xlu0 %v1342_v11, %s1943_s27 }
 0xb13   :  { %v1314_v12 = vpop.permute.xlu0 %1313 }
 0xb14   :  { %v1319_v13 = vsel %vm987_vm14, %v1314_v12, 0.0 }
 0xb15   :  { %1320 = vadd.xlane.f32.xlu1 %v1319_v13 }
 0xb17   :  { %v1316_v14 = vpop.permute.xlu0 %1315 }
 0xb18   :  { %v1322_v15 = vsel %vm987_vm14, %v1316_v14, 0.0 }
 0xb19   :  { %1323 = vadd.xlane.f32.xlu0 %v1322_v15 }
 0xb1b   :  { %v1346_v16 = vpop.permute.xlu0 %1345 }
 0xb1c   :  { %v1351_v18 = vsel %vm987_vm14, %v1346_v16, 0.0 }
 0xb1d   :  { %1352 = vadd.xlane.f32.xlu0 %v1351_v18 }
 0xb1f   :  { %v1348_v19 = vpop.permute.xlu0 %1347 }
 0xb20   :  { %v1354_v22 = vsel %vm987_vm14, %v1348_v19, 0.0 }
 0xb21   :  { %1355 = vadd.xlane.f32.xlu1 %v1354_v22 }
 0xba2   :  { %v1321_v24 = vpop.xlane.xlu1 %1320 }
 0xba6   :  { %v1324_v23 = vpop.xlane.xlu0 %1323 }
 0xbaa   :  { %v1353_v25 = vpop.xlane.xlu0 %1352 }
 0xbab   :  { %v1357_v26 = vadd.f32 %v1353_v25, %v1321_v24 }
 0xbad   :  { %v1364_v33 = vrot.slane %v1357_v26, %v2257_v31 }
 0xbae   :  { %v1356_v27 = vpop.xlane.xlu1 %1355 }
 0xbaf   :  { %v1358_v29 = vadd.f32 %v1356_v27, %v1324_v23 }
 0xbb1   :  { %v1368_v36 = vrot.slane %v1358_v29, %v2257_v31 }
 0xbb3   :  { %v1369_v37 = vsel %vm371_vm7, %v1368_v36, %v1364_v33 }
 0xbb4   :  { %v1371_v58 = vsel %vm1022_vm15, %v1369_v37, -inf }
 0xbb5   :  { %1372 = vmax.xlane.f32.xlu0 %v1371_v58 }
 0xc42   :  { %v1373_v40 = vpop.xlane.xlu0 %1372 }
 0xc43   :  { %v1378_v42 = vrot.slane %v1373_v40, %v2004_v3  ;;  %v1382_v2 = vrot.slane %v1373_v40, %v2011_v6 }
 0xc45   :  { %v1385_v51 = vsub.f32 %v1357_v26, %v1378_v42  ;;  %v1386_v43 = vsub.f32 %v1358_v29, %v1382_v2 }
 0xc47   :  { %v1387_v21 = vmul.f32 1.442695, %v1385_v51  ;;  %v1389_v44 = vmul.f32 1.442695, %v1386_v43 }
 0xc49   :  { %1850 = vpow2.f32 %v1387_v21 }
 0xc4a   :  { %1852 = vpow2.f32 %v1389_v44 }
 0xc53   :  { %v1851_v45 = vpop.eup %1850 }
 0xc54   :  { %v1853_v46 = vpop.eup %1852  ;;  %1394 = vperm.xlu1 %1813, %v1851_v45  }
 0xc55   :  { %1397 = vperm.xlu0 %1812, %v1853_v46  }
 0xcd3   :  { %v1395_v20 = vpop.permute.xlu1 %1394 }
 0xcd4   :  { %v1398_v47 = vpop.permute.xlu0 %1397  ;;  %v1402_v48 = vrot.slane %v1395_v20, %v2257_v31 }
 0xcd5   :  { %v1406_v49 = vrot.slane %v1398_v47, %v2257_v31 }
 0xcd7   :  { %v1407_v52 = vsel %vm371_vm7, %v1406_v49, %v1402_v48 }
 0xcd8   :  { %v1409_v53 = vsel %vm1022_vm15, %v1407_v52, 0.0 }
 0xcd9   :  { %1410 = vadd.xlane.f32.xlu1 %v1409_v53 }
 0xd66   :  { %v1411_v54 = vpop.xlane.xlu1 %1410 }
 0xd67   :  { %v1420_v55 = vrot.slane %v1411_v54, %v2011_v6  ;;  %v1416_v56 = vrot.slane %v1411_v54, %v2004_v3 }
 0xd69   :  { %1854 = vrcp.f32 %v1420_v55 }
 0xd6a   :  { %1856 = vrcp.f32 %v1416_v56 }
 0xd73   :  { %v1855_v4 = vpop.eup %1854 }
 0xd74   :  { %v1426_v59 = vmul.f32 %v1855_v4, %v1853_v46  ;;  %v1857_v60 = vpop.eup %1856 }
 0xd75   :  { %v1424_v61 = vmul.f32 %v1857_v60, %v1851_v45 }
 0xd76   :  { %1434 = vperm.xlu0 %1812, %v1426_v59  }
 0xd7a   :  { %1429 = vperm.xlu0 %1812, %v1424_v61  }
 0xdf5   :  { %v1435_v31 = vpop.permute.xlu0 %1434 }
 0xdf6   :  { %v1438_v39 = vmul.f32 %v1435_v31, %v2247_v17  ;;  %v1465_v28 = vmul.f32 %v1435_v31, %v2240_v57 }
 0xdf8   :  { %v1447_v34 = vsel %vm1439_vm5, %v1438_v39, 0.0  ;;  %v1474_v30 = vsel %vm1466_vm6, %v1465_v28, 0.0 }
 0xdf9   :  { %v1448_v6 = vrot.slane %v1447_v34, 4  ;;  %v1475_v32 = vrot.slane %v1474_v30, 4  ;;  %v1430_v3 = vpop.permute.xlu0 %1429 }
 0xdfa   :  { %v1437_v63 = vmul.f32 %v1430_v3, %v2240_v57  ;;  %v1464_v38 = vmul.f32 %v1430_v3, %v2247_v17 }
 0xdfb   :  { %v1449_v7 = vadd.f32 %v1448_v6, %v1447_v34  ;;  %v1476_v50 = vadd.f32 %v1475_v32, %v1474_v30 }
 0xdfc   :  { %v1440_v35 = vsel %vm1439_vm5, %v1437_v63, 0.0  ;;  %v1467_v8 = vsel %vm1466_vm6, %v1464_v38, 0.0 }
 0xdfd   :  { %v1450_v9 = vrot.slane %v1449_v7, 2  ;;  %v1477_v41 = vrot.slane %v1476_v50, 2  ;;  %v1441_v10 = vrot.slane %v1440_v35, 4  ;;  %v1468_v11 = vrot.slane %v1467_v8, 4 }
 0xdff   :  { %v1442_v12 = vadd.f32 %v1441_v10, %v1440_v35  ;;  %v1469_v13 = vadd.f32 %v1468_v11, %v1467_v8  ;;  %v1451_v14 = vadd.f32 %v1450_v9, %v1449_v7  ;;  %v1478_v15 = vadd.f32 %v1477_v41, %v1476_v50 }
 0xe01   :  { %v1443_v16 = vrot.slane %v1442_v12, 2  ;;  %v1452_v18 = vrot.slane %v1451_v14, 1  ;;  %v1470_v19 = vrot.slane %v1469_v13, 2  ;;  %v1479_v23 = vrot.slane %v1478_v15, 1 }
 0xe03   :  { %v1453_v22 = vadd.f32 %v1452_v18, %v1451_v14  ;;  %v1444_v57 = vadd.f32 %v1443_v16, %v1442_v12  ;;  %v1480_v17 = vadd.f32 %v1479_v23, %v1478_v15  ;;  %v1471_v25 = vadd.f32 %v1470_v19, %v1469_v13 }
 0xe05   :  { %1458 = vrot.lane.b32.xlu0 %v1453_v22, %s1942_s26  ;;  %v1445_v24 = vrot.slane %v1444_v57, 1  ;;  %v1472_v27 = vrot.slane %v1471_v25, 1 }
 0xe07   :  { %v1446_v26 = vadd.f32 %v1445_v24, %v1444_v57  ;;  %v1473_v29 = vadd.f32 %v1472_v27, %v1471_v25 }
 0xe09   :  { %1485 = vrot.lane.b32.xlu0 %v1480_v17, %s1942_s26 }
 0xe0d   :  { %1456 = vrot.lane.b32.xlu0 %v1446_v26, %s1942_s26 }
 0xe11   :  { %1483 = vrot.lane.b32.xlu0 %v1473_v29, %s1942_s26 }
 0xe77   :  { %v1459_v33 = vpop.permute.xlu0 %1458 }
 0xe78   :  { %v1463_v37 = vadd.f32 %v1459_v33, %v2323_v0 }
 0xe7a   :  { %v1493_v40 = vrot.slane %v1463_v37, 7 }
 0xe7b   :  { %v1486_v36 = vpop.permute.xlu0 %1485 }
 0xe7c   :  { %v1490_v42 = vadd.f32 %v1486_v36, %v2333_v5 }
 0xe7e   :  { %v1500_v21 = vrot.slane %v1490_v42, 7 }
 0xe7f   :  { %v1457_v58 = vpop.permute.xlu0 %1456 }
 0xe80   :  { %v1462_v2 = vadd.f32 %v1457_v58, %v2318_v1 }
 0xe82   :  { %v1494_v51 = vsel %vm371_vm7, %v1493_v40, %v1462_v2 }
 0xe83   :  { %1495 = vrot.lane.b32.xlu0 %v1494_v51, %s1939_s23  ;;  %v1484_v43 = vpop.permute.xlu0 %1483 }
 0xe84   :  { %v1489_v44 = vadd.f32 %v1484_v43, %v2328_v62 }
 0xe86   :  { %v1501_v45 = vsel %vm371_vm7, %v1500_v21, %v1489_v44 }
 0xe87   :  { %1502 = vrot.lane.b32.xlu0 %v1501_v45, %s1937_s4 }
 0xef5   :  { %v1496_v46 = vpop.permute.xlu0 %1495 }
 0xef9   :  { %v1503_v0 = vpop.permute.xlu0 %1502 }
 0xefa   :  { %v1505_v1 = vsel %vm987_vm14, %v1496_v46, %v1503_v0 }
 0xefb   :  { %1507 = vst.msk [vmem:[#allocation7] sm:$0x3] %vm1506_vm9, %v1505_v1 }
 0xefc   :  { %1913 = shalt.err (!%p1910_p6)
}
 0xefd   :  { %s1914_s8 = scalar_lea.hbm %s2393_s5, 32 }
 0xefe   :  { %p1915_p7 = scmp.ne.s32.totalorder %s2393_s5, %s1914_s8  ;;  %p1918_p8 = scmp.lt.u32.totalorder %s1914_s8, %s2393_s5 }
 0xf00   :  { %p1920_p9 = pnand %p1918_p8, %p1915_p7 }
 0xf02   :  { %1923 = shalt.err (!%p1920_p9)
}
 0xf03   :  { %1517 = dma.vmem_to_hbm [thread:$0]  %s1515_s29, 32, %s2393_s5, [#allocation4]  }
 0xf04   :  { %1928 = dma.done.wait [#allocation4], 32  }
 0xf05   :  { %1929 = vsyncadd [#allocation4], 4294967264 }
 0xf06   :  { %1521 = vsyncpa [#allocation3], 1 }
 0xf07   :  { %1522 = vsyncpa [#allocation6], 1 }
 0xf08   :  { %1523 = vsyncpa [#allocation4], 1 }

</bundles_post_ra>
